<compile_context>
chip_gen: v7x
topology: tpu7x:2x2x1
jax: 0.10.0
libtpu: 0.0.40
codegen_flags: <defaults>
</compile_context>

<pallas_src>
import numpy as np
import jax
import jax.numpy as jnp
from jax import lax
from jax.experimental import pallas as pl
from jax.experimental.pallas import tpu as pltpu

# Small shapes consistent with the module's forward (image pair -> embeddings).
B, C, H, W, D = 2, 4, 16, 16, 32
K = C * H * W  # 1024

_PI = float(np.pi)
_HALF_PI = float(np.pi / 2.0)
_QUARTER_PI = float(np.pi / 4.0)


def _acos(x):
    """arccos(x) for x in [-1, 1], float32, ~1e-7 abs error.

    Cephes asinf scheme using only sqrt / mul / add / where (guaranteed to
    lower in Mosaic):
        |x| <= 0.5 : asin(x)   = x + x*z*P(z),  z = x*x
        |x| >  0.5 : asin(|x|) = pi/2 - 2*asin(sqrt((1-|x|)/2))
        acos(x)    = pi/2 - asin(x)
    """
    a = jnp.abs(x)
    big = a > 0.5
    z = jnp.where(big, 0.5 * (1.0 - a), a * a)
    t = jnp.where(big, jnp.sqrt(z), a)
    p = ((((4.2163199048e-2 * z + 2.4181311049e-2) * z + 4.5470025998e-2) * z
          + 7.4953002686e-2) * z + 1.6666752422e-1)
    r = t + t * z * p                      # asin(t); valid because t <= 0.5
    asin_a = jnp.where(big, _HALF_PI - 2.0 * r, r)
    asin_x = jnp.where(x < 0.0, -asin_a, asin_a)
    return _HALF_PI - asin_x


def _cos_0_to_pi(theta):
    """cos(theta) for theta in [0, pi], float32, ~1e-7 abs error.

    cos(theta) = sin(pi/2 - theta); reduce to |arg| <= pi/4 and use the
    Cephes sinf / cosf minimax polynomials (pure VPU ops).
    """
    t = _HALF_PI - theta                   # in [-pi/2, pi/2]
    at = jnp.abs(t)
    zs = t * t
    sin_t = t + t * zs * ((-1.9515295891e-4 * zs + 8.3321608736e-3) * zs
                          - 1.6666654611e-1)
    u = _HALF_PI - at                      # in [0, pi/4] whenever |t| > pi/4
    zc = u * u
    cos_u = (1.0 - 0.5 * zc
             + zc * zc * ((2.443315711809948e-5 * zc - 1.388731625493765e-3) * zc
                          + 4.166664568298827e-2))
    return jnp.where(at <= _QUARTER_PI, sin_t, jnp.where(t >= 0.0, cos_u, -cos_u))


# trans_b contraction: lhs [D, K] contracts its last dim with rhs [B, K]'s
# last dim -> result [D, B] (batch lands on the lane axis).
_TRANS_B_DIMS = (((1,), (1,)), ((), ()))


def _fused_kernel(x1_ref, x2_ref, w_ref, cal_ref, out_ref):
    # Backbone projection on the MXU, f32 operands / f32 accumulation.
    # Lane-dense weight [D, K]; transposed results keep batch on lanes.
    e1t = lax.dot_general(w_ref[...], x1_ref[...], _TRANS_B_DIMS,
                          precision=lax.Precision.HIGHEST,
                          preferred_element_type=jnp.float32)   # [D, B]
    e2t = lax.dot_general(w_ref[...], x2_ref[...], _TRANS_B_DIMS,
                          precision=lax.Precision.HIGHEST,
                          preferred_element_type=jnp.float32)   # [D, B]

    # F.normalize(eps=1e-12) + cosine_similarity(eps=1e-8) folded:
    #   cos = <e1, e2> / max(max(||e1||,1e-12) * max(||e2||,1e-12), 1e-8)
    # Sublane (D-axis) reductions -> lane-dense [1, B] rows.
    n1 = jnp.sqrt(jnp.sum(e1t * e1t, axis=0, keepdims=True))
    n2 = jnp.sqrt(jnp.sum(e2t * e2t, axis=0, keepdims=True))
    dot12 = jnp.sum(e1t * e2t, axis=0, keepdims=True)
    denom = jnp.maximum(jnp.maximum(n1, 1e-12) * jnp.maximum(n2, 1e-12), 1e-8)
    cos = jnp.clip(dot12 / denom, -1.0, 1.0)   # guard arccos against 1 + ulp

    # Calibration epilogue fused in-kernel (scalars from SMEM):
    #   theta = clamp(arccos(cos) * w + b, 0, pi);  out = cos(theta)
    cw = cal_ref[0]
    cb = cal_ref[1]
    theta = jnp.clip(_acos(cos) * cw + cb, 0.0, _PI)
    out_ref[...] = _cos_0_to_pi(theta)         # lane-dense (1, B) store


def model_with_calibration_forward(img1, img2, w_dk, cal_params):
    """Fused Pallas forward of ModelWithCalibration.

    img1, img2 : [B, C, H, W] float32 (NCHW, as in PyTorch)
    w_dk       : [D, C*H*W] float32 synthetic backbone weight, lane-dense layout
                 (stand-in for self.model; emb = x_flat @ w_dk.T)
    cal_params : (2,) float32 = [weights, bias] calibration parameters
    returns    : [B] float32 calibrated cosine similarity
    """
    b = img1.shape[0]
    k = int(np.prod(img1.shape[1:]))
    x1 = img1.reshape(b, k)                # row-major flatten == torch .view (free)
    x2 = img2.reshape(b, k)

    out = pl.pallas_call(
        _fused_kernel,
        out_shape=jax.ShapeDtypeStruct((1, b), jnp.float32),
        in_specs=[
            pl.BlockSpec(memory_space=pltpu.MemorySpace.VMEM),   # x1  [B, K]
            pl.BlockSpec(memory_space=pltpu.MemorySpace.VMEM),   # x2  [B, K]
            pl.BlockSpec(memory_space=pltpu.MemorySpace.VMEM),   # w   [D, K]
            pl.BlockSpec(memory_space=pltpu.MemorySpace.SMEM),   # cal (2,)
        ],
        out_specs=pl.BlockSpec(memory_space=pltpu.MemorySpace.VMEM),
    )(x1, x2, w_dk, cal_params.astype(jnp.float32))

    return out[0]                           # (1, B) -> (B,): free squeeze


if __name__ == "__main__":
    key = jax.random.PRNGKey(0)
    k1, k2, k3 = jax.random.split(key, 3)

    img1 = jax.random.normal(k1, (B, C, H, W), jnp.float32)
    img2 = jax.random.normal(k2, (B, C, H, W), jnp.float32)
    # Deterministic synthetic backbone weight, stored lane-dense as [D, K]
    # (stand-in for `self.model`; emb = x_flat @ w_dk.T).
    w_dk = jax.random.normal(k3, (D, K), jnp.float32) / np.sqrt(K)

    fwd = jax.jit(model_with_calibration_forward)

    # Pure-JAX reference mirroring the PyTorch forward in f32.
    def _ref(img1, img2, w_dk, cal):
        x1 = img1.reshape(img1.shape[0], -1)
        x2 = img2.reshape(img2.shape[0], -1)
        e1 = jnp.dot(x1, w_dk.T, precision=lax.Precision.HIGHEST)
        e2 = jnp.dot(x2, w_dk.T, precision=lax.Precision.HIGHEST)
        e1n = e1 / jnp.maximum(jnp.linalg.norm(e1, axis=1, keepdims=True), 1e-12)
        e2n = e2 / jnp.maximum(jnp.linalg.norm(e2, axis=1, keepdims=True), 1e-12)
        cos = jnp.sum(e1n * e2n, axis=1) / jnp.maximum(
            jnp.linalg.norm(e1n, axis=1) * jnp.linalg.norm(e2n, axis=1), 1e-8)
        theta = jnp.arccos(jnp.clip(cos, -1.0, 1.0))
        theta = jnp.clip(theta * cal[0] + cal[1], 0.0, np.pi)
        return jnp.cos(theta)

    # Module init (weights=1, bias=0) plus a non-trivial affine to exercise the
    # arccos / affine / clamp / cos path.
    for cw, cb in [(1.0, 0.0), (1.3, 0.2)]:
        cal = jnp.array([cw, cb], jnp.float32)
        out = jax.block_until_ready(fwd(img1, img2, w_dk, cal))
        ref = _ref(img1, img2, w_dk, cal)
        assert out.shape == (B,)
        assert jnp.allclose(out, ref, atol=2e-3, rtol=0.0), (out, ref)

    print("KERNEL_OK")
</pallas_src>

<mosaic_0001>
module attributes {stable_mosaic.version = 11 : i64} {
  func.func @_fused_kernel(%arg0: memref<2x1024xf32, #tpu.memory_space<vmem>>, %arg1: memref<2x1024xf32, #tpu.memory_space<vmem>>, %arg2: memref<32x1024xf32, #tpu.memory_space<vmem>>, %arg3: memref<2xf32, #tpu.memory_space<smem>>, %arg4: memref<1x2xf32, #tpu.memory_space<vmem>>) attributes {dimension_semantics = [], scalar_prefetch = 0 : i64, scratch_operands = 0 : i64, tpu.core_type = #tpu.core_type<tc>} {
    %c0 = arith.constant 0 : index
    %c0_0 = arith.constant 0 : index
    %0 = vector.load %arg2[%c0, %c0_0] : memref<32x1024xf32, #tpu.memory_space<vmem>>, vector<32x1024xf32>
    %c0_1 = arith.constant 0 : index
    %c0_2 = arith.constant 0 : index
    %1 = vector.load %arg0[%c0_1, %c0_2] : memref<2x1024xf32, #tpu.memory_space<vmem>>, vector<2x1024xf32>
    %cst = arith.constant dense<0.000000e+00> : vector<32x2xf32>
    %2 = tpu.matmul %0, %1, %cst {dimension_numbers = #tpu.dot_dimension_numbers<[1], [1], [0], [0], [0, 0, 1, 0], [], []>, precision = #tpu.contract_precision<fp32>} : vector<32x1024xf32>, vector<2x1024xf32>, vector<32x2xf32> -> vector<32x2xf32>
    %c0_3 = arith.constant 0 : index
    %c0_4 = arith.constant 0 : index
    %3 = vector.load %arg2[%c0_3, %c0_4] : memref<32x1024xf32, #tpu.memory_space<vmem>>, vector<32x1024xf32>
    %c0_5 = arith.constant 0 : index
    %c0_6 = arith.constant 0 : index
    %4 = vector.load %arg1[%c0_5, %c0_6] : memref<2x1024xf32, #tpu.memory_space<vmem>>, vector<2x1024xf32>
    %cst_7 = arith.constant dense<0.000000e+00> : vector<32x2xf32>
    %5 = tpu.matmul %3, %4, %cst_7 {dimension_numbers = #tpu.dot_dimension_numbers<[1], [1], [0], [0], [0, 0, 1, 0], [], []>, precision = #tpu.contract_precision<fp32>} : vector<32x1024xf32>, vector<2x1024xf32>, vector<32x2xf32> -> vector<32x2xf32>
    %6 = arith.mulf %2, %2 : vector<32x2xf32>
    %cst_8 = arith.constant dense<0.000000e+00> : vector<2xf32>
    %7 = vector.multi_reduction <add>, %6, %cst_8 [0] : vector<32x2xf32> to vector<2xf32>
    %8 = vector.shape_cast %7 : vector<2xf32> to vector<1x2xf32>
    %9 = math.sqrt %8 : vector<1x2xf32>
    %10 = arith.mulf %5, %5 : vector<32x2xf32>
    %cst_9 = arith.constant dense<0.000000e+00> : vector<2xf32>
    %11 = vector.multi_reduction <add>, %10, %cst_9 [0] : vector<32x2xf32> to vector<2xf32>
    %12 = vector.shape_cast %11 : vector<2xf32> to vector<1x2xf32>
    %13 = math.sqrt %12 : vector<1x2xf32>
    %14 = arith.mulf %2, %5 : vector<32x2xf32>
    %cst_10 = arith.constant dense<0.000000e+00> : vector<2xf32>
    %15 = vector.multi_reduction <add>, %14, %cst_10 [0] : vector<32x2xf32> to vector<2xf32>
    %16 = vector.shape_cast %15 : vector<2xf32> to vector<1x2xf32>
    %cst_11 = arith.constant 9.99999996E-13 : f32
    %17 = vector.broadcast %cst_11 : f32 to vector<1x2xf32>
    %18 = arith.maximumf %9, %17 : vector<1x2xf32>
    %cst_12 = arith.constant 9.99999996E-13 : f32
    %19 = vector.broadcast %cst_12 : f32 to vector<1x2xf32>
    %20 = arith.maximumf %13, %19 : vector<1x2xf32>
    %21 = arith.mulf %18, %20 : vector<1x2xf32>
    %cst_13 = arith.constant 9.99999993E-9 : f32
    %22 = vector.broadcast %cst_13 : f32 to vector<1x2xf32>
    %23 = arith.maximumf %21, %22 : vector<1x2xf32>
    %24 = arith.divf %16, %23 : vector<1x2xf32>
    %cst_14 = arith.constant -1.000000e+00 : f32
    %cst_15 = arith.constant 1.000000e+00 : f32
    %25 = vector.broadcast %cst_14 : f32 to vector<1x2xf32>
    %26 = arith.maximumf %25, %24 : vector<1x2xf32>
    %27 = vector.broadcast %cst_15 : f32 to vector<1x2xf32>
    %28 = arith.minimumf %27, %26 : vector<1x2xf32>
    %c0_16 = arith.constant 0 : index
    %29 = memref.load %arg3[%c0_16] : memref<2xf32, #tpu.memory_space<smem>>
    %c1 = arith.constant 1 : index
    %30 = memref.load %arg3[%c1] : memref<2xf32, #tpu.memory_space<smem>>
    %31 = math.absf %28 : vector<1x2xf32>
    %cst_17 = arith.constant 5.000000e-01 : f32
    %32 = vector.broadcast %cst_17 : f32 to vector<1x2xf32>
    %33 = arith.cmpf ogt, %31, %32 : vector<1x2xf32>
    %cst_18 = arith.constant 1.000000e+00 : f32
    %34 = vector.broadcast %cst_18 : f32 to vector<1x2xf32>
    %35 = arith.subf %34, %31 : vector<1x2xf32>
    %cst_19 = arith.constant 5.000000e-01 : f32
    %36 = vector.broadcast %cst_19 : f32 to vector<1x2xf32>
    %37 = arith.mulf %36, %35 : vector<1x2xf32>
    %38 = arith.mulf %31, %31 : vector<1x2xf32>
    %39 = arith.select %33, %37, %38 : vector<1x2xi1>, vector<1x2xf32>
    %40 = math.sqrt %39 : vector<1x2xf32>
    %41 = arith.select %33, %40, %31 : vector<1x2xi1>, vector<1x2xf32>
    %cst_20 = arith.constant 4.216320e-02 : f32
    %42 = vector.broadcast %cst_20 : f32 to vector<1x2xf32>
    %43 = arith.mulf %42, %39 : vector<1x2xf32>
    %cst_21 = arith.constant 0.024181312 : f32
    %44 = vector.broadcast %cst_21 : f32 to vector<1x2xf32>
    %45 = arith.addf %43, %44 : vector<1x2xf32>
    %46 = arith.mulf %45, %39 : vector<1x2xf32>
    %cst_22 = arith.constant 0.0454700254 : f32
    %47 = vector.broadcast %cst_22 : f32 to vector<1x2xf32>
    %48 = arith.addf %46, %47 : vector<1x2xf32>
    %49 = arith.mulf %48, %39 : vector<1x2xf32>
    %cst_23 = arith.constant 0.0749530047 : f32
    %50 = vector.broadcast %cst_23 : f32 to vector<1x2xf32>
    %51 = arith.addf %49, %50 : vector<1x2xf32>
    %52 = arith.mulf %51, %39 : vector<1x2xf32>
    %cst_24 = arith.constant 0.166667521 : f32
    %53 = vector.broadcast %cst_24 : f32 to vector<1x2xf32>
    %54 = arith.addf %52, %53 : vector<1x2xf32>
    %55 = arith.mulf %41, %39 : vector<1x2xf32>
    %56 = arith.mulf %55, %54 : vector<1x2xf32>
    %57 = arith.addf %41, %56 : vector<1x2xf32>
    %cst_25 = arith.constant 2.000000e+00 : f32
    %58 = vector.broadcast %cst_25 : f32 to vector<1x2xf32>
    %59 = arith.mulf %58, %57 : vector<1x2xf32>
    %cst_26 = arith.constant 1.57079637 : f32
    %60 = vector.broadcast %cst_26 : f32 to vector<1x2xf32>
    %61 = arith.subf %60, %59 : vector<1x2xf32>
    %62 = arith.select %33, %61, %57 : vector<1x2xi1>, vector<1x2xf32>
    %cst_27 = arith.constant 0.000000e+00 : f32
    %63 = vector.broadcast %cst_27 : f32 to vector<1x2xf32>
    %64 = arith.cmpf olt, %28, %63 : vector<1x2xf32>
    %cst_28 = arith.constant 0.000000e+00 : f32
    %65 = vector.broadcast %cst_28 : f32 to vector<1x2xf32>
    %66 = arith.subf %65, %62 : vector<1x2xf32>
    %67 = arith.select %64, %66, %62 : vector<1x2xi1>, vector<1x2xf32>
    %cst_29 = arith.constant 1.57079637 : f32
    %68 = vector.broadcast %cst_29 : f32 to vector<1x2xf32>
    %69 = arith.subf %68, %67 : vector<1x2xf32>
    %70 = vector.broadcast %29 : f32 to vector<1x2xf32>
    %71 = arith.mulf %69, %70 : vector<1x2xf32>
    %72 = vector.broadcast %30 : f32 to vector<1x2xf32>
    %73 = arith.addf %71, %72 : vector<1x2xf32>
    %cst_30 = arith.constant 0.000000e+00 : f32
    %cst_31 = arith.constant 3.14159274 : f32
    %74 = vector.broadcast %cst_30 : f32 to vector<1x2xf32>
    %75 = arith.maximumf %74, %73 : vector<1x2xf32>
    %76 = vector.broadcast %cst_31 : f32 to vector<1x2xf32>
    %77 = arith.minimumf %76, %75 : vector<1x2xf32>
    %cst_32 = arith.constant 1.57079637 : f32
    %78 = vector.broadcast %cst_32 : f32 to vector<1x2xf32>
    %79 = arith.subf %78, %77 : vector<1x2xf32>
    %80 = math.absf %79 : vector<1x2xf32>
    %81 = arith.mulf %79, %79 : vector<1x2xf32>
    %82 = arith.mulf %79, %81 : vector<1x2xf32>
    %cst_33 = arith.constant -1.95152956E-4 : f32
    %83 = vector.broadcast %cst_33 : f32 to vector<1x2xf32>
    %84 = arith.mulf %83, %81 : vector<1x2xf32>
    %cst_34 = arith.constant 0.00833216123 : f32
    %85 = vector.broadcast %cst_34 : f32 to vector<1x2xf32>
    %86 = arith.addf %84, %85 : vector<1x2xf32>
    %87 = arith.mulf %86, %81 : vector<1x2xf32>
    %cst_35 = arith.constant 0.166666552 : f32
    %88 = vector.broadcast %cst_35 : f32 to vector<1x2xf32>
    %89 = arith.subf %87, %88 : vector<1x2xf32>
    %90 = arith.mulf %82, %89 : vector<1x2xf32>
    %91 = arith.addf %79, %90 : vector<1x2xf32>
    %cst_36 = arith.constant 1.57079637 : f32
    %92 = vector.broadcast %cst_36 : f32 to vector<1x2xf32>
    %93 = arith.subf %92, %80 : vector<1x2xf32>
    %94 = arith.mulf %93, %93 : vector<1x2xf32>
    %cst_37 = arith.constant 5.000000e-01 : f32
    %95 = vector.broadcast %cst_37 : f32 to vector<1x2xf32>
    %96 = arith.mulf %95, %94 : vector<1x2xf32>
    %cst_38 = arith.constant 1.000000e+00 : f32
    %97 = vector.broadcast %cst_38 : f32 to vector<1x2xf32>
    %98 = arith.subf %97, %96 : vector<1x2xf32>
    %99 = arith.mulf %94, %94 : vector<1x2xf32>
    %cst_39 = arith.constant 2.44331568E-5 : f32
    %100 = vector.broadcast %cst_39 : f32 to vector<1x2xf32>
    %101 = arith.mulf %100, %94 : vector<1x2xf32>
    %cst_40 = arith.constant 0.00138873165 : f32
    %102 = vector.broadcast %cst_40 : f32 to vector<1x2xf32>
    %103 = arith.subf %101, %102 : vector<1x2xf32>
    %104 = arith.mulf %103, %94 : vector<1x2xf32>
    %cst_41 = arith.constant 0.0416666456 : f32
    %105 = vector.broadcast %cst_41 : f32 to vector<1x2xf32>
    %106 = arith.addf %104, %105 : vector<1x2xf32>
    %107 = arith.mulf %99, %106 : vector<1x2xf32>
    %108 = arith.addf %98, %107 : vector<1x2xf32>
    %cst_42 = arith.constant 0.785398185 : f32
    %109 = vector.broadcast %cst_42 : f32 to vector<1x2xf32>
    %110 = arith.cmpf ole, %80, %109 : vector<1x2xf32>
    %cst_43 = arith.constant 0.000000e+00 : f32
    %111 = vector.broadcast %cst_43 : f32 to vector<1x2xf32>
    %112 = arith.cmpf oge, %79, %111 : vector<1x2xf32>
    %cst_44 = arith.constant 0.000000e+00 : f32
    %113 = vector.broadcast %cst_44 : f32 to vector<1x2xf32>
    %114 = arith.subf %113, %108 : vector<1x2xf32>
    %115 = arith.select %112, %108, %114 : vector<1x2xi1>, vector<1x2xf32>
    %116 = arith.select %110, %91, %115 : vector<1x2xi1>, vector<1x2xf32>
    %c0_45 = arith.constant 0 : index
    %c0_46 = arith.constant 0 : index
    %117 = vector.load %arg4[%c0_45, %c0_46] : memref<1x2xf32, #tpu.memory_space<vmem>>, vector<1x2xf32>
    tpu.vector_store %arg4[%c0_45, %c0_46], %116 {strides = array<i32>} : memref<1x2xf32, #tpu.memory_space<vmem>>, vector<1x2xf32>,
    return
  }
}

</mosaic_0001>

<bundles_post_ra>
// kernel: model_with_calibration_forward.1
= control target key start
LH: loop header
LB: loop body
LE: loop exit
PB: predicated region body
PF: predicated region fallthrough
CT: control target
= control target key end

     0   :  { %9 = vsyncpa [#allocation4], 0  ;;  %s6969_s0 = inlined_call_operand.vmem [shape: f32[2,1024], index: 0, kind: input, shape index: {}]   ;;  %s6970_s1 = inlined_call_operand.vmem [shape: f32[2,1024], index: 1, kind: input, shape index: {}]   ;;  %s6971_s2 = inlined_call_operand.vmem [shape: f32[32,1024], index: 2, kind: input, shape index: {}]   ;;  %s6972_s3 = inlined_call_operand.vmem [shape: f32[2], index: 3, kind: input, shape index: {}]   ;;  %s6973_s4 = inlined_call_operand.hbm [shape: f32[1,2], index: 4, kind: output, shape index: {}]  }
   0x1   :  { %10 = vsyncpa [#allocation3], 0  ;;  %s23_s17 = sshll.u32 %s6972_s3, 4  ;;  %s24_s17 = int_to_ptr.vmem [resolvable:$true] %s23_s17 }
   0x2   :  { %s5819_s18 = scalar_lea.vmem %s24_s17, 16  ;;  %p5824_p1 = scmp.lt.s32.totalorder %s24_s17, %s24_s17 }
   0x3   :  { %p5820_p0 = scmp.ne.s32.totalorder %s24_s17, %s5819_s18  ;;  %p5825_p2 = scmp.lt.s32.totalorder %s5819_s18, %s5819_s18 }
   0x5   :  { %p5826_p3 = por %p5825_p2, %p5824_p1 }
   0x7   :  { %p5827_p4 = pnand %p5826_p3, %p5820_p0 }
   0x9   :  { %5830 = shalt.err (!%p5827_p4)
}
   0xa   :  { %s5857_s19 = smov [#allocation2]  }
   0xb   :  { %26 = dma.vmem_to_smem %s24_s17, 16, %s5857_s19, [#allocation4]  }
   0xc   :  { %5853 = dma.done.wait [#allocation4], 16  }
   0xd   :  { %5854 = vsyncadd [#allocation4], 4294967280 }
   0xe   :  { %30 = sfence }
   0xf   :  { %v71_v0 = vlaneseq  ;;  %v32_v1 = vld [vmem:[%s6971_s2 + $0x8] sm:$0xff]  ;;  %v5858_v2 = vmov 1983009808   ;;  %v31_v5 = vld [vmem:[%s6971_s2] sm:$0xff]  ;;  %vm5279_vm0 = vcmask 15360   ;;  %s5433_s7 = sld [smem:[#allocation2 + $0x1]] }
  0x10   :  { %v69_v3 = vunpack.c.l.s4 %v5858_v2  ;;  %v5891_v4 = vand.u32 4294901760, %v32_v1  ;;  %v40_v6 = vld [vmem:[%s6971_s2 + $0x48] sm:$0xff]  ;;  %v39_v7 = vld [vmem:[%s6971_s2 + $0x40] sm:$0xff]  ;;  %v5902_v9 = vand.u32 4294901760, %v31_v5  ;;  %s5859_s8 = smov [#allocation5]   ;;  %vm5415_vm10 = vcmask 8192  }
  0x11   :  { %v72_v8 = vshrl.u32 %v71_v0, 7  ;;  %v5904_v10 = vand.u32 4294901760, %v40_v6  ;;  %v5906_v11 = vand.u32 4294901760, %v39_v7  ;;  %v48_v12 = vld [vmem:[%s6971_s2 + $0x88] sm:$0xff]  ;;  %v47_v13 = vld [vmem:[%s6971_s2 + $0x80] sm:$0xff]  ;;  %s5423_s9 = sshll.u32 %s5859_s8, 4  ;;  %s5424_s9 = int_to_ptr.vmem [resolvable:$true] %s5423_s9 }
  0x12   :  { %v70_v14 = vunpack.c.0.s8 %v69_v3  ;;  %v5915_v15 = vsub.f32 %v32_v1, %v5891_v4  ;;  %v5917_v16 = vand.u32 4294901760, %v48_v12  ;;  %v56_v17 = vld [vmem:[%s6971_s2 + $0xc8] sm:$0xff]  ;;  %v5925_v18 = vld [vmem:[%s6969_s0] sm:$0xff]  ;;  %v5933_v20 = vsub.f32 %v31_v5, %v5902_v9  ;;  %s5831_s10 = scalar_lea.vmem %s5424_s9, 16  ;;  %s5835_s11 = scalar_lea.vmem %s5424_s9, 32 }
  0x13   :  { %v5930_v19 = vld [vmem:[%s6970_s1] sm:$0xff]  ;;  %v5936_v21 = vsub.f32 %v40_v6, %v5904_v10  ;;  %v5939_v22 = vsub.f32 %v39_v7, %v5906_v11  ;;  %v5941_v23 = vand.u32 4294901760, %v47_v13  ;;  %v5957_v29 = vand.u32 4294901760, %v56_v17  ;;  %p5832_p5 = scmp.ne.s32.totalorder %s5424_s9, %s5831_s10  ;;  %p5836_p6 = scmp.lt.s32.totalorder %s5424_s9, %s5424_s9 }
  0x14   :  { %v5943_v24 = vsub.s32 %v70_v14, %v72_v8  ;;  %v5946_v25 = vand.u32 4294901760, %v5915_v15  ;;  %v5949_v26 = vand.u32 4294901760, %v5933_v20  ;;  %v5955_v28 = vsub.f32 %v48_v12, %v5917_v16  ;;  %v55_v40 = vld [vmem:[%s6971_s2 + $0xc0] sm:$0xff]  ;;  %p5837_p7 = scmp.lt.s32.totalorder %s5835_s11, %s5831_s10 }
  0x15   :  { %v5952_v27 = vand.u32 4294901760, %v5936_v21  ;;  %v5968_v34 = vand.u32 4294901760, %v5939_v22  ;;  %v5971_v35 = vsub.f32 %v47_v13, %v5941_v23  ;;  %v5986_v44 = vsub.f32 %v56_v17, %v5957_v29 }
  0x16   :  { %v74_v30 = vrot.slane %v5925_v18, %v5943_v24  ;;  %v2680_v31 = vrot.slane %v5930_v19, %v5943_v24  ;;  %v178_v32 = vsub.f32 %v5915_v15, %v5946_v25  ;;  %v184_v33 = vsub.f32 %v5933_v20, %v5949_v26  ;;  %p5838_p8 = por %p5837_p7, %p5836_p6 }
  0x17   :  { %v193_v42 = vsub.f32 %v5936_v21, %v5952_v27  ;;  %v5983_v43 = vand.u32 4294901760, %v5955_v28  ;;  %v199_v50 = vsub.f32 %v5939_v22, %v5968_v34  ;;  %v6001_v51 = vand.u32 4294901760, %v5971_v35 }
  0x18   :  { %v82_v36 = vcombine.high %v74_v30, %v74_v30  ;;  %v2688_v37 = vcombine.high %v2680_v31, %v2680_v31  ;;  %v5973_v38 = vand.u32 4294901760, %v74_v30  ;;  %v5975_v39 = vand.u32 4294901760, %v2680_v31  ;;  %p5839_p9 = pnand %p5838_p8, %p5832_p5 }
  0x19   :  { %v179_v41 = vand.u32 4294901760, %v178_v32  ;;  %v185_v49 = vand.u32 4294901760, %v184_v33  ;;  %v6003_v52 = vand.u32 4294901760, %v55_v40  ;;  %v194_v57 = vand.u32 4294901760, %v193_v42 }
  0x1a   :  { %v5988_v45 = vand.u32 4294901760, %v82_v36  ;;  %v5990_v46 = vand.u32 4294901760, %v2688_v37  ;;  %v5993_v47 = vsub.f32 %v74_v30, %v5973_v38  ;;  %v5996_v48 = vsub.f32 %v2680_v31, %v5975_v39 }
  0x1b   :  { %180 = vmatprep.mubr.f32.mxu0 %v179_v41  ;;  %2786 = vmatprep.mubr.f32.mxu1 %v179_v41  ;;  %v6018_v58 = vand.u32 4294901760, %v5986_v44  ;;  %v6021_v59 = vsub.f32 %v55_v40, %v6003_v52  ;;  %v200_v0 = vand.u32 4294901760, %v199_v50  ;;  %v208_v1 = vsub.f32 %v5955_v28, %v5983_v43 }
  0x1c   :  { %110 = vmatprep.subr.mxu0 %v5988_v45  ;;  %2716 = vmatprep.subr.mxu1 %v5990_v46  ;;  %v6008_v53 = vsub.f32 %v82_v36, %v5988_v45  ;;  %v6011_v54 = vsub.f32 %v2688_v37, %v5990_v46  ;;  %v244_v55 = vand.u32 4294901760, %v5993_v47  ;;  %v2850_v56 = vand.u32 4294901760, %v5996_v48 }
  0x1d   :  { %112 = vmatpush1.xpose.msra.mxu0 %v5973_v38  ;;  %2718 = vmatpush1.xpose.msra.mxu1 %v5975_v39  ;;  %v214_v5 = vsub.f32 %v5971_v35, %v6001_v51  ;;  %v6042_v6 = vand.u32 4294901760, %v6021_v59  ;;  %v223_v7 = vsub.f32 %v5986_v44, %v6018_v58  ;;  %v209_v17 = vand.u32 4294901760, %v208_v1  ;;  %v57_v1 = vld [vmem:[%s6971_s2 + $0xd0] sm:$0xff] }
  0x1e   :  { %v238_v60 = vand.u32 4294901760, %v6008_v53  ;;  %v2844_v61 = vand.u32 4294901760, %v6011_v54  ;;  %v245_v62 = vsub.f32 %v5993_v47, %v244_v55  ;;  %v2851_v63 = vsub.f32 %v5996_v48, %v2850_v56 }
  0x1f   :  { %v215_v30 = vand.u32 4294901760, %v214_v5  ;;  %v229_v31 = vsub.f32 %v6021_v59, %v6042_v6  ;;  %v224_v32 = vand.u32 4294901760, %v223_v7  ;;  %v6267_v7 = vand.u32 4294901760, %v57_v1 }
  0x20   :  { %186 = vmatmul.mubr.f32.vlgmr.msra.gmra.mrb[0].mxu0 %v185_v49  ;;  %2792 = vmatmul.mubr.f32.vlgmr.msra.gmra.mrb[0].mxu1 %v185_v49  ;;  %v239_v2 = vsub.f32 %v6008_v53, %v238_v60  ;;  %v2845_v3 = vsub.f32 %v6011_v54, %v2844_v61  ;;  %v246_v13 = vand.u32 4294901760, %v245_v62  ;;  %v2852_v14 = vand.u32 4294901760, %v2851_v63 }
  0x21   :  { %195 = vmatprep.mubr.f32.mxu0 %v194_v57  ;;  %2801 = vmatprep.mubr.f32.mxu1 %v194_v57  ;;  %v230_v33 = vand.u32 4294901760, %v229_v31  ;;  %v58_v57 = vld [vmem:[%s6971_s2 + $0xd8] sm:$0xff] }
  0x22   :  { %v240_v8 = vand.u32 4294901760, %v239_v2  ;;  %v2846_v12 = vand.u32 4294901760, %v2845_v3 }
  0x24   :  { %201 = vmatmul.mubr.f32.gmra.mrb[2].mxu0 %v200_v0  ;;  %241 = vmatprep.subr.mxu0 %v240_v8 }
  0x25   :  { %2807 = vmatmul.mubr.f32.gmra.mrb[2].mxu1 %v200_v0  ;;  %2847 = vmatprep.subr.mxu1 %v2846_v12  ;;  %v6250_v0 = vand.u32 4294901760, %v58_v57 }
  0x26   :  { %247 = vmatpush1.xpose.msra.mxu0 %v246_v13  ;;  %2853 = vmatpush1.xpose.msra.mxu1 %v2852_v14 }
  0x27   :  { %210 = vmatprep.mubr.f32.mxu0 %v209_v17  ;;  %2816 = vmatprep.mubr.f32.mxu1 %v209_v17  ;;  %v6277_v13 = vsub.f32 %v58_v57, %v6250_v0 }
  0x28   :  { %216 = vmatmul.mubr.f32.gmra.mrb[4].mxu0 %v215_v30  ;;  %341 = vmatprep.subr.mxu0 %v6008_v53 }
  0x29   :  { %2822 = vmatmul.mubr.f32.gmra.mrb[4].mxu1 %v215_v30  ;;  %225 = vmatprep.mubr.f32.mxu0 %v224_v32 }
  0x2a   :  { %2831 = vmatprep.mubr.f32.mxu1 %v224_v32  ;;  %2947 = vmatprep.subr.mxu1 %v6011_v54  ;;  %v6293_v32 = vsub.f32 %v57_v1, %v6267_v7 }
  0x2c   :  { %231 = vmatmul.mubr.f32.gmra.mrb[6].mxu0 %v230_v33 }
  0x2d   :  { %2837 = vmatmul.mubr.f32.gmra.mrb[6].mxu1 %v230_v33  ;;  %311 = vmatprep.mubr.f32.mxu0 %v5891_v4 }
  0x2e   :  { %2917 = vmatprep.mubr.f32.mxu1 %v5891_v4 }
  0x30   :  { %313 = vmatmul.mubr.f32.vlgmr.msra.gmra.mrb[0].mxu0 %v5902_v9 }
  0x31   :  { %2919 = vmatmul.mubr.f32.vlgmr.msra.gmra.mrb[0].mxu1 %v5902_v9  ;;  %318 = vmatprep.mubr.f32.mxu0 %v5904_v10 }
  0x32   :  { %2924 = vmatprep.mubr.f32.mxu1 %v5904_v10  ;;  %344 = vmatpush1.xpose.msra.mxu0 %v5993_v47  ;;  %v50_v47 = vld [vmem:[%s6971_s2 + $0x98] sm:$0xff] }
  0x33   :  { %2950 = vmatpush1.xpose.msra.mxu1 %v5996_v48  ;;  %445 = vmatprep.subr.mxu0 %v5988_v45 }
  0x34   :  { %320 = vmatmul.mubr.f32.gmra.mrb[2].mxu0 %v5906_v11  ;;  %3051 = vmatprep.subr.mxu1 %v5990_v46 }
  0x35   :  { %2926 = vmatmul.mubr.f32.gmra.mrb[2].mxu1 %v5906_v11  ;;  %325 = vmatprep.mubr.f32.mxu0 %v5917_v16 }
  0x36   :  { %2931 = vmatprep.mubr.f32.mxu1 %v5917_v16 }
  0x38   :  { %327 = vmatmul.mubr.f32.gmra.mrb[4].mxu0 %v5941_v23 }
  0x39   :  { %2933 = vmatmul.mubr.f32.gmra.mrb[4].mxu1 %v5941_v23  ;;  %332 = vmatprep.mubr.f32.mxu0 %v5957_v29 }
  0x3a   :  { %2938 = vmatprep.mubr.f32.mxu1 %v5957_v29 }
  0x3c   :  { %334 = vmatmul.mubr.f32.gmra.mrb[6].mxu0 %v6003_v52 }
  0x3d   :  { %2940 = vmatmul.mubr.f32.gmra.mrb[6].mxu1 %v6003_v52  ;;  %409 = vmatprep.mubr.f32.mxu0 %v5915_v15 }
  0x3e   :  { %3015 = vmatprep.mubr.f32.mxu1 %v5915_v15  ;;  %v67_v15 = vcombine.high %v5925_v18, %v5925_v18 }
  0x40   :  { %412 = vmatmul.mubr.f32.vlgmr.msra.gmra.mrb[0].mxu0 %v5933_v20 }
  0x41   :  { %3018 = vmatmul.mubr.f32.vlgmr.msra.gmra.mrb[0].mxu1 %v5933_v20  ;;  %418 = vmatprep.mubr.f32.mxu0 %v5936_v21  ;;  %v2673_v20 = vcombine.high %v5930_v19, %v5930_v19 }
  0x42   :  { %3024 = vmatprep.mubr.f32.mxu1 %v5936_v21  ;;  %447 = vmatpush1.xpose.msra.mxu0 %v5973_v38  ;;  %v6113_v21 = vrot.slane %v67_v15, %v5943_v24  ;;  %v6299_v15 = vand.u32 4294901760, %v6277_v13 }
  0x43   :  { %3053 = vmatpush1.xpose.msra.mxu1 %v5975_v39  ;;  %558 = vmatprep.subr.mxu0 %v238_v60  ;;  %v6117_v18 = vrot.slane %v2673_v20, %v5943_v24 }
  0x44   :  { %421 = vmatmul.mubr.f32.gmra.mrb[2].mxu0 %v5939_v22  ;;  %3164 = vmatprep.subr.mxu1 %v2844_v61  ;;  %v83_v19 = vcombine.high %v6113_v21, %v6113_v21 }
  0x45   :  { %3027 = vmatmul.mubr.f32.gmra.mrb[2].mxu1 %v5939_v22  ;;  %427 = vmatprep.mubr.f32.mxu0 %v5955_v28  ;;  %v2689_v22 = vcombine.high %v6117_v18, %v6117_v18  ;;  %v6196_v48 = vand.u32 4294901760, %v6117_v18 }
  0x46   :  { %3033 = vmatprep.mubr.f32.mxu1 %v5955_v28 }
  0x48   :  { %430 = vmatmul.mubr.f32.gmra.mrb[4].mxu0 %v5971_v35 }
  0x49   :  { %3036 = vmatmul.mubr.f32.gmra.mrb[4].mxu1 %v5971_v35  ;;  %436 = vmatprep.mubr.f32.mxu0 %v5986_v44 }
  0x4a   :  { %3042 = vmatprep.mubr.f32.mxu1 %v5986_v44 }
  0x4c   :  { %439 = vmatmul.mubr.f32.gmra.mrb[6].mxu0 %v6021_v59 }
  0x4d   :  { %3045 = vmatmul.mubr.f32.gmra.mrb[6].mxu1 %v6021_v59  ;;  %513 = vmatprep.mubr.f32.mxu0 %v5946_v25 }
  0x4e   :  { %3119 = vmatprep.mubr.f32.mxu1 %v5946_v25  ;;  %v6130_v25 = vand.u32 4294901760, %v83_v19 }
  0x50   :  { %517 = vmatmul.mubr.f32.vlgmr.msra.gmra.mrb[0].mxu0 %v5949_v26 }
  0x51   :  { %3123 = vmatmul.mubr.f32.vlgmr.msra.gmra.mrb[0].mxu1 %v5949_v26  ;;  %524 = vmatprep.mubr.f32.mxu0 %v5952_v27  ;;  %v6133_v26 = vand.u32 4294901760, %v2689_v22 }
  0x52   :  { %3130 = vmatprep.mubr.f32.mxu1 %v5952_v27  ;;  %562 = vmatpush1.xpose.msra.mxu0 %v244_v55  ;;  %v6142_v27 = vsub.f32 %v83_v19, %v6130_v25  ;;  %v6212_v55 = vand.u32 4294901760, %v50_v47 }
  0x53   :  { %3168 = vmatpush1.xpose.msra.mxu1 %v2850_v56  ;;  %655 = vmatprep.subr.mxu0 %v5988_v45  ;;  %v6147_v28 = vsub.f32 %v2689_v22, %v6133_v26  ;;  %v41_v45 = vld [vmem:[%s6971_s2 + $0x50] sm:$0xff]  ;;  %v6304_v22 = vand.u32 4294901760, %v6293_v32 }
  0x54   :  { %528 = vmatmul.mubr.f32.gmra.mrb[2].mxu0 %v5968_v34  ;;  %3261 = vmatprep.subr.mxu1 %v5990_v46  ;;  %v878_v35 = vand.u32 4294901760, %v6142_v27  ;;  %v6190_v46 = vand.u32 4294901760, %v6113_v21  ;;  %v49_v56 = vld [vmem:[%s6971_s2 + $0x90] sm:$0xff]  ;;  %v6248_v63 = vsub.f32 %v50_v47, %v6212_v55 }
  0x55   :  { %3134 = vmatmul.mubr.f32.gmra.mrb[2].mxu1 %v5968_v34  ;;  %535 = vmatprep.mubr.f32.mxu0 %v5983_v43  ;;  %v34_v34 = vld [vmem:[%s6971_s2 + $0x18] sm:$0xff]  ;;  %v3484_v36 = vand.u32 4294901760, %v6147_v28  ;;  %v6238_v60 = vand.u32 4294901760, %v49_v56 }
  0x56   :  { %3141 = vmatprep.mubr.f32.mxu1 %v5983_v43  ;;  %v6160_v37 = vand.u32 4294901760, %v34_v34  ;;  %v879_v40 = vsub.f32 %v6142_v27, %v878_v35  ;;  %v6274_v12 = vand.u32 4294901760, %v6248_v63 }
  0x57   :  { %v3485_v42 = vsub.f32 %v6147_v28, %v3484_v36 }
  0x58   :  { %539 = vmatmul.mubr.f32.gmra.mrb[4].mxu0 %v6001_v51  ;;  %v6181_v43 = vsub.f32 %v34_v34, %v6160_v37  ;;  %v880_v49 = vand.u32 4294901760, %v879_v40  ;;  %v848_v33 = vsub.f32 %v6248_v63, %v6274_v12  ;;  %v863_v34 = vsub.f32 %v6277_v13, %v6299_v15 }
  0x59   :  { %3145 = vmatmul.mubr.f32.gmra.mrb[4].mxu1 %v6001_v51  ;;  %546 = vmatprep.mubr.f32.mxu0 %v6018_v58  ;;  %v6202_v51 = vand.u32 4294901760, %v41_v45  ;;  %v3486_v53 = vand.u32 4294901760, %v3485_v42 }
  0x5a   :  { %3152 = vmatprep.mubr.f32.mxu1 %v6018_v58  ;;  %v6229_v58 = vsub.f32 %v6117_v18, %v6196_v48  ;;  %v864_v40 = vand.u32 4294901760, %v863_v34 }
  0x5b   :  { %v6236_v59 = vsub.f32 %v41_v45, %v6202_v51 }
  0x5c   :  { %550 = vmatmul.mubr.f32.gmra.mrb[6].mxu0 %v6042_v6  ;;  %v3490_v2 = vand.u32 4294901760, %v6229_v58 }
  0x5d   :  { %3156 = vmatmul.mubr.f32.gmra.mrb[6].mxu1 %v6042_v6  ;;  %626 = vmatprep.mubr.f32.mxu0 %v5891_v4  ;;  %v6262_v5 = vand.u32 4294901760, %v6236_v59  ;;  %v6265_v6 = vsub.f32 %v49_v56, %v6238_v60 }
  0x5e   :  { %3232 = vmatprep.mubr.f32.mxu1 %v5891_v4 }
  0x5f   :  { %v839_v30 = vsub.f32 %v6236_v59, %v6262_v5  ;;  %v6290_v31 = vand.u32 4294901760, %v6265_v6 }
  0x60   :  { %628 = vmatmul.mubr.f32.vlgmr.msra.gmra.mrb[0].mxu0 %v5902_v9 }
  0x61   :  { %3234 = vmatmul.mubr.f32.vlgmr.msra.gmra.mrb[0].mxu1 %v5902_v9  ;;  %633 = vmatprep.mubr.f32.mxu0 %v5904_v10  ;;  %v840_v18 = vand.u32 4294901760, %v839_v30  ;;  %v854_v19 = vsub.f32 %v6265_v6, %v6290_v31 }
  0x62   :  { %3239 = vmatprep.mubr.f32.mxu1 %v5904_v10  ;;  %657 = vmatpush1.xpose.msra.mxu0 %v5973_v38  ;;  %v33_v38 = vld [vmem:[%s6971_s2 + $0x10] sm:$0xff] }
  0x63   :  { %3263 = vmatpush1.xpose.msra.mxu1 %v5975_v39  ;;  %750 = vmatprep.subr.mxu0 %v6130_v25  ;;  %v42_v39 = vld [vmem:[%s6971_s2 + $0x58] sm:$0xff]  ;;  %v6173_v41 = vand.u32 4294901760, %v33_v38 }
  0x64   :  { %635 = vmatmul.mubr.f32.gmra.mrb[2].mxu0 %v5906_v11  ;;  %3356 = vmatprep.subr.mxu1 %v6133_v26  ;;  %v6183_v44 = vand.u32 4294901760, %v42_v39 }
  0x65   :  { %3241 = vmatmul.mubr.f32.gmra.mrb[2].mxu1 %v5906_v11  ;;  %640 = vmatprep.mubr.f32.mxu0 %v5917_v16  ;;  %v6200_v50 = vsub.f32 %v33_v38, %v6173_v41  ;;  %v855_v38 = vand.u32 4294901760, %v854_v19 }
  0x66   :  { %3246 = vmatprep.mubr.f32.mxu1 %v5917_v16  ;;  %v6210_v54 = vsub.f32 %v42_v39, %v6183_v44  ;;  %v869_v39 = vsub.f32 %v6293_v32, %v6304_v22 }
  0x68   :  { %642 = vmatmul.mubr.f32.gmra.mrb[4].mxu0 %v5941_v23  ;;  %v6245_v62 = vand.u32 4294901760, %v6210_v54  ;;  %v870_v42 = vand.u32 4294901760, %v869_v39 }
  0x69   :  { %3248 = vmatmul.mubr.f32.gmra.mrb[4].mxu1 %v5941_v23  ;;  %647 = vmatprep.mubr.f32.mxu0 %v5957_v29 }
  0x6a   :  { %3253 = vmatprep.mubr.f32.mxu1 %v5957_v29  ;;  %v833_v8 = vsub.f32 %v6210_v54, %v6245_v62 }
  0x6c   :  { %649 = vmatmul.mubr.f32.gmra.mrb[6].mxu0 %v6003_v52 }
  0x6d   :  { %3255 = vmatmul.mubr.f32.gmra.mrb[6].mxu1 %v6003_v52  ;;  %721 = vmatprep.mubr.f32.mxu0 %v5891_v4 }
  0x6e   :  { %3327 = vmatprep.mubr.f32.mxu1 %v5891_v4  ;;  %v6207_v4 = vand.u32 4294901760, %v6181_v43 }
  0x70   :  { %723 = vmatmul.mubr.f32.vlgmr.msra.gmra.mrb[0].mxu0 %v5902_v9  ;;  %v818_v61 = vsub.f32 %v6181_v43, %v6207_v4 }
  0x71   :  { %3329 = vmatmul.mubr.f32.vlgmr.msra.gmra.mrb[0].mxu1 %v5902_v9  ;;  %728 = vmatprep.mubr.f32.mxu0 %v5904_v10  ;;  %v6221_v9 = vsub.f32 %v6113_v21, %v6190_v46 }
  0x72   :  { %3334 = vmatprep.mubr.f32.mxu1 %v5904_v10  ;;  %752 = vmatpush1.xpose.msra.mxu0 %v6190_v46  ;;  %v6233_v10 = vand.u32 4294901760, %v6200_v50 }
  0x73   :  { %3358 = vmatpush1.xpose.msra.mxu1 %v6196_v48  ;;  %881 = vmatprep.subr.mxu0 %v880_v49 }
  0x74   :  { %730 = vmatmul.mubr.f32.gmra.mrb[2].mxu0 %v5906_v11  ;;  %3487 = vmatprep.subr.mxu1 %v3486_v53  ;;  %v824_v3 = vsub.f32 %v6200_v50, %v6233_v10 }
  0x75   :  { %3336 = vmatmul.mubr.f32.gmra.mrb[2].mxu1 %v5906_v11  ;;  %735 = vmatprep.mubr.f32.mxu0 %v5917_v16  ;;  %v884_v11 = vand.u32 4294901760, %v6221_v9 }
  0x76   :  { %3341 = vmatprep.mubr.f32.mxu1 %v5917_v16  ;;  %v819_v16 = vand.u32 4294901760, %v818_v61  ;;  %v825_v17 = vand.u32 4294901760, %v824_v3 }
  0x77   :  { %v885_v14 = vsub.f32 %v6221_v9, %v884_v11 }
  0x78   :  { %737 = vmatmul.mubr.f32.gmra.mrb[4].mxu0 %v5941_v23 }
  0x79   :  { %3343 = vmatmul.mubr.f32.gmra.mrb[4].mxu1 %v5941_v23  ;;  %742 = vmatprep.mubr.f32.mxu0 %v5957_v29  ;;  %v3491_v23 = vsub.f32 %v6229_v58, %v3490_v2  ;;  %v886_v20 = vand.u32 4294901760, %v885_v14 }
  0x7a   :  { %3348 = vmatprep.mubr.f32.mxu1 %v5957_v29  ;;  %v834_v29 = vand.u32 4294901760, %v833_v8  ;;  %v60_v8 = vld [vmem:[%s6971_s2 + $0xe8] sm:$0xff] }
  0x7b   :  { %v3492_v21 = vand.u32 4294901760, %v3491_v23 }
  0x7c   :  { %744 = vmatmul.mubr.f32.gmra.mrb[6].mxu0 %v6003_v52 }
  0x7d   :  { %3350 = vmatmul.mubr.f32.gmra.mrb[6].mxu1 %v6003_v52  ;;  %820 = vmatprep.mubr.f32.mxu0 %v819_v16  ;;  %v849_v52 = vand.u32 4294901760, %v848_v33 }
  0x7e   :  { %3426 = vmatprep.mubr.f32.mxu1 %v819_v16  ;;  %v51_v16 = vld [vmem:[%s6971_s2 + $0xa0] sm:$0xff] }
  0x7f   :  { %v6508_v14 = vand.u32 4294901760, %v51_v16 }
  0x80   :  { %826 = vmatmul.mubr.f32.vlgmr.msra.gmra.mrb[0].mxu0 %v825_v17 }
  0x81   :  { %3432 = vmatmul.mubr.f32.vlgmr.msra.gmra.mrb[0].mxu1 %v825_v17  ;;  %835 = vmatprep.mubr.f32.mxu0 %v834_v29 }
  0x82   :  { %3441 = vmatprep.mubr.f32.mxu1 %v834_v29  ;;  %887 = vmatpush1.xpose.msra.mxu0 %v886_v20  ;;  %v6535_v20 = vsub.f32 %v51_v16, %v6508_v14 }
  0x83   :  { %3493 = vmatpush1.xpose.msra.mxu1 %v3492_v21  ;;  %981 = vmatprep.subr.mxu0 %v6142_v27  ;;  %v6370_v27 = vld [vmem:[%s6969_s0 + $0x8] sm:$0xff] }
  0x84   :  { %841 = vmatmul.mubr.f32.gmra.mrb[2].mxu0 %v840_v18  ;;  %3587 = vmatprep.subr.mxu1 %v6147_v28  ;;  %v6377_v28 = vld [vmem:[%s6970_s1 + $0x8] sm:$0xff]  ;;  %v6560_v39 = vand.u32 4294901760, %v6535_v20 }
  0x85   :  { %3447 = vmatmul.mubr.f32.gmra.mrb[2].mxu1 %v840_v18  ;;  %850 = vmatprep.mubr.f32.mxu0 %v849_v52 }
  0x86   :  { %3456 = vmatprep.mubr.f32.mxu1 %v849_v52 }
  0x88   :  { %856 = vmatmul.mubr.f32.gmra.mrb[4].mxu0 %v855_v38 }
  0x89   :  { %3462 = vmatmul.mubr.f32.gmra.mrb[4].mxu1 %v855_v38  ;;  %865 = vmatprep.mubr.f32.mxu0 %v864_v40 }
  0x8a   :  { %3471 = vmatprep.mubr.f32.mxu1 %v864_v40 }
  0x8c   :  { %871 = vmatmul.mubr.f32.gmra.mrb[6].mxu0 %v870_v42 }
  0x8d   :  { %3477 = vmatmul.mubr.f32.gmra.mrb[6].mxu1 %v870_v42  ;;  %951 = vmatprep.mubr.f32.mxu0 %v6160_v37 }
  0x8e   :  { %3557 = vmatprep.mubr.f32.mxu1 %v6160_v37 }
  0x90   :  { %953 = vmatmul.mubr.f32.vlgmr.msra.gmra.mrb[0].mxu0 %v6173_v41 }
  0x91   :  { %3559 = vmatmul.mubr.f32.vlgmr.msra.gmra.mrb[0].mxu1 %v6173_v41  ;;  %958 = vmatprep.mubr.f32.mxu0 %v6183_v44 }
  0x92   :  { %3564 = vmatprep.mubr.f32.mxu1 %v6183_v44  ;;  %984 = vmatpush1.xpose.msra.mxu0 %v6221_v9 }
  0x93   :  { %3590 = vmatpush1.xpose.msra.mxu1 %v6229_v58  ;;  %1085 = vmatprep.subr.mxu0 %v6130_v25 }
  0x94   :  { %960 = vmatmul.mubr.f32.gmra.mrb[2].mxu0 %v6202_v51  ;;  %3691 = vmatprep.subr.mxu1 %v6133_v26 }
  0x95   :  { %3566 = vmatmul.mubr.f32.gmra.mrb[2].mxu1 %v6202_v51  ;;  %965 = vmatprep.mubr.f32.mxu0 %v6212_v55 }
  0x96   :  { %3571 = vmatprep.mubr.f32.mxu1 %v6212_v55 }
  0x98   :  { %967 = vmatmul.mubr.f32.gmra.mrb[4].mxu0 %v6238_v60 }
  0x99   :  { %3573 = vmatmul.mubr.f32.gmra.mrb[4].mxu1 %v6238_v60  ;;  %972 = vmatprep.mubr.f32.mxu0 %v6250_v0 }
  0x9a   :  { %3578 = vmatprep.mubr.f32.mxu1 %v6250_v0 }
  0x9c   :  { %974 = vmatmul.mubr.f32.gmra.mrb[6].mxu0 %v6267_v7 }
  0x9d   :  { %3580 = vmatmul.mubr.f32.gmra.mrb[6].mxu1 %v6267_v7  ;;  %1049 = vmatprep.mubr.f32.mxu0 %v6181_v43 }
  0x9e   :  { %3655 = vmatprep.mubr.f32.mxu1 %v6181_v43 }
  0xa0   :  { %1052 = vmatmul.mubr.f32.vlgmr.msra.gmra.mrb[0].mxu0 %v6200_v50 }
  0xa1   :  { %3658 = vmatmul.mubr.f32.vlgmr.msra.gmra.mrb[0].mxu1 %v6200_v50  ;;  %1058 = vmatprep.mubr.f32.mxu0 %v6210_v54 }
  0xa2   :  { %3664 = vmatprep.mubr.f32.mxu1 %v6210_v54  ;;  %1087 = vmatpush1.xpose.msra.mxu0 %v6190_v46  ;;  %v44_v54 = vld [vmem:[%s6971_s2 + $0x68] sm:$0xff] }
  0xa3   :  { %3693 = vmatpush1.xpose.msra.mxu1 %v6196_v48  ;;  %1198 = vmatprep.subr.mxu0 %v878_v35 }
  0xa4   :  { %1061 = vmatmul.mubr.f32.gmra.mrb[2].mxu0 %v6236_v59  ;;  %3804 = vmatprep.subr.mxu1 %v3484_v36 }
  0xa5   :  { %3667 = vmatmul.mubr.f32.gmra.mrb[2].mxu1 %v6236_v59  ;;  %1067 = vmatprep.mubr.f32.mxu0 %v6248_v63  ;;  %v43_v59 = vld [vmem:[%s6971_s2 + $0x60] sm:$0xff] }
  0xa6   :  { %3673 = vmatprep.mubr.f32.mxu1 %v6248_v63 }
  0xa8   :  { %1070 = vmatmul.mubr.f32.gmra.mrb[4].mxu0 %v6265_v6 }
  0xa9   :  { %3676 = vmatmul.mubr.f32.gmra.mrb[4].mxu1 %v6265_v6  ;;  %1076 = vmatprep.mubr.f32.mxu0 %v6277_v13 }
  0xaa   :  { %3682 = vmatprep.mubr.f32.mxu1 %v6277_v13 }
  0xac   :  { %1079 = vmatmul.mubr.f32.gmra.mrb[6].mxu0 %v6293_v32 }
  0xad   :  { %3685 = vmatmul.mubr.f32.gmra.mrb[6].mxu1 %v6293_v32  ;;  %1153 = vmatprep.mubr.f32.mxu0 %v6207_v4  ;;  %v59_v32 = vld [vmem:[%s6971_s2 + $0xe0] sm:$0xff] }
  0xae   :  { %3759 = vmatprep.mubr.f32.mxu1 %v6207_v4  ;;  %v35_v4 = vld [vmem:[%s6971_s2 + $0x20] sm:$0xff]  ;;  %v6537_v21 = vand.u32 4294901760, %v59_v32 }
  0xaf   :  { %v6443_v9 = vand.u32 4294901760, %v35_v4 }
  0xb0   :  { %1157 = vmatmul.mubr.f32.vlgmr.msra.gmra.mrb[0].mxu0 %v6233_v10  ;;  %v6563_v40 = vsub.f32 %v59_v32, %v6537_v21 }
  0xb1   :  { %3763 = vmatmul.mubr.f32.vlgmr.msra.gmra.mrb[0].mxu1 %v6233_v10  ;;  %1164 = vmatprep.mubr.f32.mxu0 %v6245_v62  ;;  %v6453_v10 = vand.u32 4294901760, %v44_v54 }
  0xb2   :  { %3770 = vmatprep.mubr.f32.mxu1 %v6245_v62  ;;  %1202 = vmatpush1.xpose.msra.mxu0 %v884_v11  ;;  %v52_v62 = vld [vmem:[%s6971_s2 + $0xa8] sm:$0xff]  ;;  %v6470_v11 = vsub.f32 %v35_v4, %v6443_v9  ;;  %v6574_v4 = vand.u32 4294901760, %v6563_v40 }
  0xb3   :  { %3808 = vmatpush1.xpose.msra.mxu1 %v3490_v2  ;;  %1295 = vmatprep.subr.mxu0 %v6130_v25  ;;  %v6382_v25 = vrot.slane %v6370_v27, %v5943_v24  ;;  %v6472_v2 = vand.u32 4294901760, %v43_v59  ;;  %v6482_v6 = vand.u32 4294901760, %v52_v62 }
  0xb4   :  { %1168 = vmatmul.mubr.f32.gmra.mrb[2].mxu0 %v6262_v5  ;;  %3901 = vmatprep.subr.mxu1 %v6133_v26  ;;  %v6387_v26 = vrot.slane %v6377_v28, %v5943_v24 }
  0xb5   :  { %3774 = vmatmul.mubr.f32.gmra.mrb[2].mxu1 %v6262_v5  ;;  %1175 = vmatprep.mubr.f32.mxu0 %v6274_v12  ;;  %v99_v35 = vcombine.high %v6382_v25, %v6382_v25  ;;  %v6460_v61 = vand.u32 4294901760, %v6382_v25  ;;  %v6480_v5 = vsub.f32 %v44_v54, %v6453_v10  ;;  %v6506_v13 = vsub.f32 %v43_v59, %v6472_v2 }
  0xb6   :  { %3781 = vmatprep.mubr.f32.mxu1 %v6274_v12  ;;  %v2705_v36 = vcombine.high %v6387_v26, %v6387_v26  ;;  %v6466_v63 = vand.u32 4294901760, %v6387_v26  ;;  %v6518_v30 = vsub.f32 %v52_v62, %v6482_v6 }
  0xb7   :  { %v6400_v43 = vand.u32 4294901760, %v99_v35  ;;  %v6515_v17 = vand.u32 4294901760, %v6480_v5 }
  0xb8   :  { %1179 = vmatmul.mubr.f32.gmra.mrb[4].mxu0 %v6290_v31  ;;  %v6403_v45 = vand.u32 4294901760, %v2705_v36  ;;  %v6499_v12 = vsub.f32 %v6387_v26, %v6466_v63  ;;  %v6544_v19 = vand.u32 4294901760, %v6518_v30 }
  0xb9   :  { %3785 = vmatmul.mubr.f32.gmra.mrb[4].mxu1 %v6290_v31  ;;  %1186 = vmatprep.mubr.f32.mxu0 %v6299_v15  ;;  %v6412_v47 = vsub.f32 %v99_v35, %v6400_v43  ;;  %v6520_v31 = vand.u32 4294901760, %v60_v8  ;;  %v1473_v18 = vsub.f32 %v6480_v5, %v6515_v17 }
  0xba   :  { %3792 = vmatprep.mubr.f32.mxu1 %v6299_v15  ;;  %v6417_v49 = vsub.f32 %v2705_v36, %v6403_v45  ;;  %v4130_v29 = vand.u32 4294901760, %v6499_v12  ;;  %v6532_v15 = vand.u32 4294901760, %v6506_v13  ;;  %v1488_v42 = vsub.f32 %v6518_v30, %v6544_v19 }
  0xbc   :  { %1190 = vmatmul.mubr.f32.gmra.mrb[6].mxu0 %v6304_v22  ;;  %v4124_v50 = vand.u32 4294901760, %v6417_v49  ;;  %v1479_v38 = vsub.f32 %v6506_v13, %v6532_v15 }
  0xbd   :  { %3796 = vmatmul.mubr.f32.gmra.mrb[6].mxu1 %v6304_v22  ;;  %1266 = vmatprep.mubr.f32.mxu0 %v6160_v37  ;;  %v6547_v22 = vsub.f32 %v60_v8, %v6520_v31 }
  0xbe   :  { %3872 = vmatprep.mubr.f32.mxu1 %v6160_v37  ;;  %v4125_v57 = vsub.f32 %v6417_v49, %v4124_v50  ;;  %v1480_v36 = vand.u32 4294901760, %v1479_v38 }
  0xc0   :  { %1268 = vmatmul.mubr.f32.vlgmr.msra.gmra.mrb[0].mxu0 %v6173_v41  ;;  %v4126_v3 = vand.u32 4294901760, %v4125_v57  ;;  %v1509_v57 = vsub.f32 %v6563_v40, %v6574_v4 }
  0xc1   :  { %3874 = vmatmul.mubr.f32.vlgmr.msra.gmra.mrb[0].mxu1 %v6173_v41  ;;  %1273 = vmatprep.mubr.f32.mxu0 %v6183_v44 }
  0xc2   :  { %3879 = vmatprep.mubr.f32.mxu1 %v6183_v44  ;;  %1297 = vmatpush1.xpose.msra.mxu0 %v6190_v46  ;;  %v36_v46 = vld [vmem:[%s6971_s2 + $0x28] sm:$0xff]  ;;  %v1510_v62 = vand.u32 4294901760, %v1509_v57 }
  0xc3   :  { %3903 = vmatpush1.xpose.msra.mxu1 %v6196_v48  ;;  %1390 = vmatprep.subr.mxu0 %v6400_v43  ;;  %v1518_v48 = vand.u32 4294901760, %v6412_v47  ;;  %v6430_v53 = vand.u32 4294901760, %v36_v46 }
  0xc4   :  { %1275 = vmatmul.mubr.f32.gmra.mrb[2].mxu0 %v6202_v51  ;;  %3996 = vmatprep.subr.mxu1 %v6403_v45 }
  0xc5   :  { %3881 = vmatmul.mubr.f32.gmra.mrb[2].mxu1 %v6202_v51  ;;  %1280 = vmatprep.mubr.f32.mxu0 %v6212_v55  ;;  %v1519_v56 = vsub.f32 %v6412_v47, %v1518_v48  ;;  %v6451_v58 = vsub.f32 %v36_v46, %v6430_v53  ;;  %v1494_v46 = vsub.f32 %v6535_v20, %v6560_v39 }
  0xc6   :  { %3886 = vmatprep.mubr.f32.mxu1 %v6212_v55 }
  0xc7   :  { %v1520_v1 = vand.u32 4294901760, %v1519_v56  ;;  %v1495_v56 = vand.u32 4294901760, %v1494_v46 }
  0xc8   :  { %1282 = vmatmul.mubr.f32.gmra.mrb[4].mxu0 %v6238_v60 }
  0xc9   :  { %3888 = vmatmul.mubr.f32.gmra.mrb[4].mxu1 %v6238_v60  ;;  %1287 = vmatprep.mubr.f32.mxu0 %v6250_v0 }
  0xca   :  { %3893 = vmatprep.mubr.f32.mxu1 %v6250_v0 }
  0xcc   :  { %1289 = vmatmul.mubr.f32.gmra.mrb[6].mxu0 %v6267_v7 }
  0xcd   :  { %3895 = vmatmul.mubr.f32.gmra.mrb[6].mxu1 %v6267_v7  ;;  %1361 = vmatprep.mubr.f32.mxu0 %v6160_v37 }
  0xce   :  { %3967 = vmatprep.mubr.f32.mxu1 %v6160_v37  ;;  %v6477_v37 = vand.u32 4294901760, %v6451_v58 }
  0xd0   :  { %1363 = vmatmul.mubr.f32.vlgmr.msra.gmra.mrb[0].mxu0 %v6173_v41  ;;  %v1458_v23 = vsub.f32 %v6451_v58, %v6477_v37 }
  0xd1   :  { %3969 = vmatmul.mubr.f32.vlgmr.msra.gmra.mrb[0].mxu1 %v6173_v41  ;;  %1368 = vmatprep.mubr.f32.mxu0 %v6183_v44  ;;  %v6491_v41 = vsub.f32 %v6382_v25, %v6460_v61  ;;  %v6569_v25 = vand.u32 4294901760, %v6547_v22 }
  0xd2   :  { %3974 = vmatprep.mubr.f32.mxu1 %v6183_v44  ;;  %1392 = vmatpush1.xpose.msra.mxu0 %v6460_v61  ;;  %v6503_v44 = vand.u32 4294901760, %v6470_v11 }
  0xd3   :  { %3998 = vmatpush1.xpose.msra.mxu1 %v6466_v63  ;;  %1521 = vmatprep.subr.mxu0 %v1520_v1  ;;  %v1503_v54 = vsub.f32 %v6547_v22, %v6569_v25 }
  0xd4   :  { %1370 = vmatmul.mubr.f32.gmra.mrb[2].mxu0 %v6202_v51  ;;  %4127 = vmatprep.subr.mxu1 %v4126_v3  ;;  %v1464_v33 = vsub.f32 %v6470_v11, %v6503_v44  ;;  %v37_v3 = vld [vmem:[%s6971_s2 + $0x30] sm:$0xff] }
  0xd5   :  { %3976 = vmatmul.mubr.f32.gmra.mrb[2].mxu1 %v6202_v51  ;;  %1375 = vmatprep.mubr.f32.mxu0 %v6212_v55  ;;  %v1524_v51 = vand.u32 4294901760, %v6491_v41  ;;  %v1504_v59 = vand.u32 4294901760, %v1503_v54  ;;  %v6705_v16 = vand.u32 4294901760, %v37_v3 }
  0xd6   :  { %3981 = vmatprep.mubr.f32.mxu1 %v6212_v55  ;;  %v1459_v55 = vand.u32 4294901760, %v1458_v23  ;;  %v1465_v34 = vand.u32 4294901760, %v1464_v33  ;;  %v54_v23 = vld [vmem:[%s6971_s2 + $0xb8] sm:$0xff] }
  0xd7   :  { %v1525_v52 = vsub.f32 %v6491_v41, %v1524_v51  ;;  %v6732_v32 = vsub.f32 %v37_v3, %v6705_v16 }
  0xd8   :  { %1377 = vmatmul.mubr.f32.gmra.mrb[4].mxu0 %v6238_v60 }
  0xd9   :  { %3983 = vmatmul.mubr.f32.gmra.mrb[4].mxu1 %v6238_v60  ;;  %1382 = vmatprep.mubr.f32.mxu0 %v6250_v0  ;;  %v4131_v60 = vsub.f32 %v6499_v12, %v4130_v29  ;;  %v1526_v26 = vand.u32 4294901760, %v1525_v52 }
  0xda   :  { %3988 = vmatprep.mubr.f32.mxu1 %v6250_v0  ;;  %v1474_v0 = vand.u32 4294901760, %v1473_v18 }
  0xdb   :  { %v4132_v35 = vand.u32 4294901760, %v4131_v60 }
  0xdc   :  { %1384 = vmatmul.mubr.f32.gmra.mrb[6].mxu0 %v6267_v7 }
  0xdd   :  { %3990 = vmatmul.mubr.f32.gmra.mrb[6].mxu1 %v6267_v7  ;;  %1460 = vmatprep.mubr.f32.mxu0 %v1459_v55  ;;  %v1489_v7 = vand.u32 4294901760, %v1488_v42 }
  0xde   :  { %4066 = vmatprep.mubr.f32.mxu1 %v1459_v55  ;;  %v62_v55 = vld [vmem:[%s6971_s2 + $0xf8] sm:$0xff] }
  0xdf   :  { %v6782_v38 = vand.u32 4294901760, %v62_v55 }
  0xe0   :  { %1466 = vmatmul.mubr.f32.vlgmr.msra.gmra.mrb[0].mxu0 %v1465_v34 }
  0xe1   :  { %4072 = vmatmul.mubr.f32.vlgmr.msra.gmra.mrb[0].mxu1 %v1465_v34  ;;  %1475 = vmatprep.mubr.f32.mxu0 %v1474_v0  ;;  %v6809_v46 = vsub.f32 %v62_v55, %v6782_v38 }
  0xe2   :  { %4081 = vmatprep.mubr.f32.mxu1 %v1474_v0  ;;  %1527 = vmatpush1.xpose.msra.mxu0 %v1526_v26 }
  0xe3   :  { %4133 = vmatpush1.xpose.msra.mxu1 %v4132_v35  ;;  %1621 = vmatprep.subr.mxu0 %v6412_v47  ;;  %v84_v47 = vcombine.high %v6370_v27, %v6370_v27 }
  0xe4   :  { %1481 = vmatmul.mubr.f32.gmra.mrb[2].mxu0 %v1480_v36  ;;  %4227 = vmatprep.subr.mxu1 %v6417_v49  ;;  %v2690_v49 = vcombine.high %v6377_v28, %v6377_v28 }
  0xe5   :  { %4087 = vmatmul.mubr.f32.gmra.mrb[2].mxu1 %v1480_v36  ;;  %1490 = vmatprep.mubr.f32.mxu0 %v1489_v7 }
  0xe6   :  { %4096 = vmatprep.mubr.f32.mxu1 %v1489_v7  ;;  %v6649_v27 = vrot.slane %v2690_v49, %v5943_v24 }
  0xe8   :  { %1496 = vmatmul.mubr.f32.gmra.mrb[4].mxu0 %v1495_v56 }
  0xe9   :  { %4102 = vmatmul.mubr.f32.gmra.mrb[4].mxu1 %v1495_v56  ;;  %1505 = vmatprep.mubr.f32.mxu0 %v1504_v59 }
  0xea   :  { %4111 = vmatprep.mubr.f32.mxu1 %v1504_v59 }
  0xec   :  { %1511 = vmatmul.mubr.f32.gmra.mrb[6].mxu0 %v1510_v62 }
  0xed   :  { %4117 = vmatmul.mubr.f32.gmra.mrb[6].mxu1 %v1510_v62  ;;  %1591 = vmatprep.mubr.f32.mxu0 %v6430_v53  ;;  %v6831_v62 = vand.u32 4294901760, %v6809_v46 }
  0xee   :  { %4197 = vmatprep.mubr.f32.mxu1 %v6430_v53 }
  0xf0   :  { %1593 = vmatmul.mubr.f32.vlgmr.msra.gmra.mrb[0].mxu0 %v6443_v9 }
  0xf1   :  { %4199 = vmatmul.mubr.f32.vlgmr.msra.gmra.mrb[0].mxu1 %v6443_v9  ;;  %1598 = vmatprep.mubr.f32.mxu0 %v6453_v10 }
  0xf2   :  { %4204 = vmatprep.mubr.f32.mxu1 %v6453_v10  ;;  %1624 = vmatpush1.xpose.msra.mxu0 %v6491_v41 }
  0xf3   :  { %4230 = vmatpush1.xpose.msra.mxu1 %v6499_v12  ;;  %1725 = vmatprep.subr.mxu0 %v6400_v43 }
  0xf4   :  { %1600 = vmatmul.mubr.f32.gmra.mrb[2].mxu0 %v6472_v2  ;;  %4331 = vmatprep.subr.mxu1 %v6403_v45 }
  0xf5   :  { %4206 = vmatmul.mubr.f32.gmra.mrb[2].mxu1 %v6472_v2  ;;  %1605 = vmatprep.mubr.f32.mxu0 %v6482_v6 }
  0xf6   :  { %4211 = vmatprep.mubr.f32.mxu1 %v6482_v6 }
  0xf8   :  { %1607 = vmatmul.mubr.f32.gmra.mrb[4].mxu0 %v6508_v14 }
  0xf9   :  { %4213 = vmatmul.mubr.f32.gmra.mrb[4].mxu1 %v6508_v14  ;;  %1612 = vmatprep.mubr.f32.mxu0 %v6520_v31 }
  0xfa   :  { %4218 = vmatprep.mubr.f32.mxu1 %v6520_v31 }
  0xfc   :  { %1614 = vmatmul.mubr.f32.gmra.mrb[6].mxu0 %v6537_v21 }
  0xfd   :  { %4220 = vmatmul.mubr.f32.gmra.mrb[6].mxu1 %v6537_v21  ;;  %1689 = vmatprep.mubr.f32.mxu0 %v6451_v58 }
  0xfe   :  { %4295 = vmatprep.mubr.f32.mxu1 %v6451_v58 }
 0x100   :  { %1692 = vmatmul.mubr.f32.vlgmr.msra.gmra.mrb[0].mxu0 %v6470_v11 }
 0x101   :  { %4298 = vmatmul.mubr.f32.vlgmr.msra.gmra.mrb[0].mxu1 %v6470_v11  ;;  %1698 = vmatprep.mubr.f32.mxu0 %v6480_v5 }
 0x102   :  { %4304 = vmatprep.mubr.f32.mxu1 %v6480_v5  ;;  %1727 = vmatpush1.xpose.msra.mxu0 %v6460_v61 }
 0x103   :  { %4333 = vmatpush1.xpose.msra.mxu1 %v6466_v63  ;;  %1838 = vmatprep.subr.mxu0 %v1518_v48  ;;  %v6645_v48 = vrot.slane %v84_v47, %v5943_v24 }
 0x104   :  { %1701 = vmatmul.mubr.f32.gmra.mrb[2].mxu0 %v6506_v13  ;;  %4444 = vmatprep.subr.mxu1 %v4124_v50 }
 0x105   :  { %4307 = vmatmul.mubr.f32.gmra.mrb[2].mxu1 %v6506_v13  ;;  %1707 = vmatprep.mubr.f32.mxu0 %v6518_v30  ;;  %v100_v28 = vcombine.high %v6645_v48, %v6645_v48  ;;  %v6722_v13 = vand.u32 4294901760, %v6645_v48 }
 0x106   :  { %4313 = vmatprep.mubr.f32.mxu1 %v6518_v30 }
 0x107   :  { %v6662_v24 = vand.u32 4294901760, %v100_v28 }
 0x108   :  { %1710 = vmatmul.mubr.f32.gmra.mrb[4].mxu0 %v6535_v20 }
 0x109   :  { %4316 = vmatmul.mubr.f32.gmra.mrb[4].mxu1 %v6535_v20  ;;  %1716 = vmatprep.mubr.f32.mxu0 %v6547_v22  ;;  %v6674_v50 = vsub.f32 %v100_v28, %v6662_v24  ;;  %v53_v20 = vld [vmem:[%s6971_s2 + $0xb0] sm:$0xff] }
 0x10a   :  { %4322 = vmatprep.mubr.f32.mxu1 %v6547_v22  ;;  %v6770_v22 = vand.u32 4294901760, %v53_v20 }
 0x10c   :  { %1719 = vmatmul.mubr.f32.gmra.mrb[6].mxu0 %v6563_v40 }
 0x10d   :  { %4325 = vmatmul.mubr.f32.gmra.mrb[6].mxu1 %v6563_v40  ;;  %1793 = vmatprep.mubr.f32.mxu0 %v6477_v37 }
 0x10e   :  { %4399 = vmatprep.mubr.f32.mxu1 %v6477_v37  ;;  %v46_v37 = vld [vmem:[%s6971_s2 + $0x78] sm:$0xff] }
 0x10f   :  { %v6715_v12 = vand.u32 4294901760, %v46_v37 }
 0x110   :  { %1797 = vmatmul.mubr.f32.vlgmr.msra.gmra.mrb[0].mxu0 %v6503_v44 }
 0x111   :  { %4403 = vmatmul.mubr.f32.vlgmr.msra.gmra.mrb[0].mxu1 %v6503_v44  ;;  %1804 = vmatprep.mubr.f32.mxu0 %v6515_v17  ;;  %v45_v44 = vld [vmem:[%s6971_s2 + $0x70] sm:$0xff]  ;;  %v6742_v33 = vsub.f32 %v46_v37, %v6715_v12 }
 0x112   :  { %4410 = vmatprep.mubr.f32.mxu1 %v6515_v17  ;;  %1842 = vmatpush1.xpose.msra.mxu0 %v1524_v51  ;;  %v6728_v17 = vand.u32 4294901760, %v6649_v27  ;;  %v6734_v51 = vand.u32 4294901760, %v45_v44 }
 0x113   :  { %4448 = vmatpush1.xpose.msra.mxu1 %v4130_v29  ;;  %1935 = vmatprep.subr.mxu0 %v6400_v43  ;;  %v2706_v43 = vcombine.high %v6649_v27, %v6649_v27  ;;  %v6777_v60 = vand.u32 4294901760, %v6742_v33 }
 0x114   :  { %1808 = vmatmul.mubr.f32.gmra.mrb[2].mxu0 %v6532_v15  ;;  %4541 = vmatprep.subr.mxu1 %v6403_v45  ;;  %v6761_v18 = vsub.f32 %v6649_v27, %v6728_v17 }
 0x115   :  { %4414 = vmatmul.mubr.f32.gmra.mrb[2].mxu1 %v6532_v15  ;;  %1815 = vmatprep.mubr.f32.mxu0 %v6544_v19  ;;  %v6665_v45 = vand.u32 4294901760, %v2706_v43  ;;  %v6744_v15 = vand.u32 4294901760, %v54_v23  ;;  %v2113_v35 = vsub.f32 %v6742_v33, %v6777_v60 }
 0x116   :  { %4421 = vmatprep.mubr.f32.mxu1 %v6544_v19  ;;  %v6768_v19 = vsub.f32 %v45_v44, %v6734_v51  ;;  %v4770_v40 = vand.u32 4294901760, %v6761_v18 }
 0x117   :  { %v6679_v58 = vsub.f32 %v2706_v43, %v6665_v45  ;;  %v6780_v34 = vsub.f32 %v54_v23, %v6744_v15  ;;  %v2143_v43 = vsub.f32 %v6809_v46, %v6831_v62 }
 0x118   :  { %1819 = vmatmul.mubr.f32.gmra.mrb[4].mxu0 %v6560_v39  ;;  %v6794_v42 = vand.u32 4294901760, %v6768_v19 }
 0x119   :  { %4425 = vmatmul.mubr.f32.gmra.mrb[4].mxu1 %v6560_v39  ;;  %1826 = vmatprep.mubr.f32.mxu0 %v6569_v25  ;;  %v4764_v1 = vand.u32 4294901760, %v6679_v58  ;;  %v61_v39 = vld [vmem:[%s6971_s2 + $0xf0] sm:$0xff]  ;;  %v6806_v36 = vand.u32 4294901760, %v6780_v34  ;;  %v2144_v37 = vand.u32 4294901760, %v2143_v43 }
 0x11a   :  { %4432 = vmatprep.mubr.f32.mxu1 %v6569_v25  ;;  %v6797_v25 = vsub.f32 %v53_v20, %v6770_v22  ;;  %v6799_v26 = vand.u32 4294901760, %v61_v39  ;;  %v2119_v54 = vsub.f32 %v6768_v19, %v6794_v42 }
 0x11b   :  { %v4765_v41 = vsub.f32 %v6679_v58, %v4764_v1  ;;  %v2128_v59 = vsub.f32 %v6780_v34, %v6806_v36 }
 0x11c   :  { %1830 = vmatmul.mubr.f32.gmra.mrb[6].mxu0 %v6574_v4  ;;  %v6822_v56 = vand.u32 4294901760, %v6797_v25  ;;  %v6825_v57 = vsub.f32 %v61_v39, %v6799_v26 }
 0x11d   :  { %4436 = vmatmul.mubr.f32.gmra.mrb[6].mxu1 %v6574_v4  ;;  %1906 = vmatprep.mubr.f32.mxu0 %v6430_v53  ;;  %v4766_v29 = vand.u32 4294901760, %v4765_v41 }
 0x11e   :  { %4512 = vmatprep.mubr.f32.mxu1 %v6430_v53  ;;  %v2134_v27 = vsub.f32 %v6797_v25, %v6822_v56  ;;  %v6836_v28 = vand.u32 4294901760, %v6825_v57 }
 0x120   :  { %1908 = vmatmul.mubr.f32.vlgmr.msra.gmra.mrb[0].mxu0 %v6443_v9  ;;  %v2149_v3 = vsub.f32 %v6825_v57, %v6836_v28 }
 0x121   :  { %4514 = vmatmul.mubr.f32.vlgmr.msra.gmra.mrb[0].mxu1 %v6443_v9  ;;  %1913 = vmatprep.mubr.f32.mxu0 %v6453_v10 }
 0x122   :  { %4519 = vmatprep.mubr.f32.mxu1 %v6453_v10  ;;  %1937 = vmatpush1.xpose.msra.mxu0 %v6460_v61  ;;  %v38_v61 = vld [vmem:[%s6971_s2 + $0x38] sm:$0xff]  ;;  %s5349_s2 = sld [smem:[#allocation2]] }
 0x123   :  { %4543 = vmatpush1.xpose.msra.mxu1 %v6466_v63  ;;  %2030 = vmatprep.subr.mxu0 %v6662_v24  ;;  %v2158_v63 = vand.u32 4294901760, %v6674_v50  ;;  %v6692_v11 = vand.u32 4294901760, %v38_v61 }
 0x124   :  { %1915 = vmatmul.mubr.f32.gmra.mrb[2].mxu0 %v6472_v2  ;;  %4636 = vmatprep.subr.mxu1 %v6665_v45 }
 0x125   :  { %4521 = vmatmul.mubr.f32.gmra.mrb[2].mxu1 %v6472_v2  ;;  %1920 = vmatprep.mubr.f32.mxu0 %v6482_v6  ;;  %v2159_v5 = vsub.f32 %v6674_v50, %v2158_v63  ;;  %v6713_v8 = vsub.f32 %v38_v61, %v6692_v11  ;;  %v2135_v61 = vand.u32 4294901760, %v2134_v27 }
 0x126   :  { %4526 = vmatprep.mubr.f32.mxu1 %v6482_v6 }
 0x127   :  { %v2160_v30 = vand.u32 4294901760, %v2159_v5  ;;  %v2150_v5 = vand.u32 4294901760, %v2149_v3 }
 0x128   :  { %1922 = vmatmul.mubr.f32.gmra.mrb[4].mxu0 %v6508_v14 }
 0x129   :  { %4528 = vmatmul.mubr.f32.gmra.mrb[4].mxu1 %v6508_v14  ;;  %1927 = vmatprep.mubr.f32.mxu0 %v6520_v31 }
 0x12a   :  { %4533 = vmatprep.mubr.f32.mxu1 %v6520_v31 }
 0x12c   :  { %1929 = vmatmul.mubr.f32.gmra.mrb[6].mxu0 %v6537_v21 }
 0x12d   :  { %4535 = vmatmul.mubr.f32.gmra.mrb[6].mxu1 %v6537_v21  ;;  %2001 = vmatprep.mubr.f32.mxu0 %v6430_v53 }
 0x12e   :  { %4607 = vmatprep.mubr.f32.mxu1 %v6430_v53  ;;  %v6739_v53 = vand.u32 4294901760, %v6713_v8 }
 0x130   :  { %2003 = vmatmul.mubr.f32.vlgmr.msra.gmra.mrb[0].mxu0 %v6443_v9  ;;  %v2098_v52 = vsub.f32 %v6713_v8, %v6739_v53 }
 0x131   :  { %4609 = vmatmul.mubr.f32.vlgmr.msra.gmra.mrb[0].mxu1 %v6443_v9  ;;  %2008 = vmatprep.mubr.f32.mxu0 %v6453_v10  ;;  %v6753_v9 = vsub.f32 %v6645_v48, %v6722_v13  ;;  %v2120_v48 = vand.u32 4294901760, %v2119_v54 }
 0x132   :  { %4614 = vmatprep.mubr.f32.mxu1 %v6453_v10  ;;  %2032 = vmatpush1.xpose.msra.mxu0 %v6722_v13  ;;  %v6765_v10 = vand.u32 4294901760, %v6732_v32 }
 0x133   :  { %4638 = vmatpush1.xpose.msra.mxu1 %v6728_v17  ;;  %2161 = vmatprep.subr.mxu0 %v2160_v30 }
 0x134   :  { %2010 = vmatmul.mubr.f32.gmra.mrb[2].mxu0 %v6472_v2  ;;  %4767 = vmatprep.subr.mxu1 %v4766_v29  ;;  %v2104_v0 = vsub.f32 %v6732_v32, %v6765_v10 }
 0x135   :  { %4616 = vmatmul.mubr.f32.gmra.mrb[2].mxu1 %v6472_v2  ;;  %2015 = vmatprep.mubr.f32.mxu0 %v6482_v6  ;;  %v2164_v2 = vand.u32 4294901760, %v6753_v9 }
 0x136   :  { %4621 = vmatprep.mubr.f32.mxu1 %v6482_v6  ;;  %v2099_v6 = vand.u32 4294901760, %v2098_v52  ;;  %v2105_v7 = vand.u32 4294901760, %v2104_v0 }
 0x137   :  { %v2165_v4 = vsub.f32 %v6753_v9, %v2164_v2 }
 0x138   :  { %2017 = vmatmul.mubr.f32.gmra.mrb[4].mxu0 %v6508_v14 }
 0x139   :  { %4623 = vmatmul.mubr.f32.gmra.mrb[4].mxu1 %v6508_v14  ;;  %2022 = vmatprep.mubr.f32.mxu0 %v6520_v31  ;;  %v4771_v14 = vsub.f32 %v6761_v18, %v4770_v40  ;;  %v2166_v47 = vand.u32 4294901760, %v2165_v4 }
 0x13a   :  { %4628 = vmatprep.mubr.f32.mxu1 %v6520_v31  ;;  %v2114_v31 = vand.u32 4294901760, %v2113_v35 }
 0x13b   :  { %v4772_v49 = vand.u32 4294901760, %v4771_v14 }
 0x13c   :  { %2024 = vmatmul.mubr.f32.gmra.mrb[6].mxu0 %v6537_v21 }
 0x13d   :  { %4630 = vmatmul.mubr.f32.gmra.mrb[6].mxu1 %v6537_v21  ;;  %2100 = vmatprep.mubr.f32.mxu0 %v2099_v6  ;;  %v2129_v21 = vand.u32 4294901760, %v2128_v59 }
 0x13e   :  { %4706 = vmatprep.mubr.f32.mxu1 %v2099_v6 }
 0x140   :  { %2106 = vmatmul.mubr.f32.vlgmr.msra.gmra.mrb[0].mxu0 %v2105_v7 }
 0x141   :  { %4712 = vmatmul.mubr.f32.vlgmr.msra.gmra.mrb[0].mxu1 %v2105_v7  ;;  %2115 = vmatprep.mubr.f32.mxu0 %v2114_v31 }
 0x142   :  { %4721 = vmatprep.mubr.f32.mxu1 %v2114_v31  ;;  %2167 = vmatpush1.xpose.msra.mxu0 %v2166_v47 }
 0x143   :  { %4773 = vmatpush1.xpose.msra.mxu1 %v4772_v49  ;;  %2261 = vmatprep.subr.mxu0 %v6674_v50 }
 0x144   :  { %2121 = vmatmul.mubr.f32.gmra.mrb[2].mxu0 %v2120_v48  ;;  %4867 = vmatprep.subr.mxu1 %v6679_v58 }
 0x145   :  { %4727 = vmatmul.mubr.f32.gmra.mrb[2].mxu1 %v2120_v48  ;;  %2130 = vmatprep.mubr.f32.mxu0 %v2129_v21 }
 0x146   :  { %4736 = vmatprep.mubr.f32.mxu1 %v2129_v21 }
 0x148   :  { %2136 = vmatmul.mubr.f32.gmra.mrb[4].mxu0 %v2135_v61 }
 0x149   :  { %4742 = vmatmul.mubr.f32.gmra.mrb[4].mxu1 %v2135_v61  ;;  %2145 = vmatprep.mubr.f32.mxu0 %v2144_v37 }
 0x14a   :  { %4751 = vmatprep.mubr.f32.mxu1 %v2144_v37 }
 0x14c   :  { %2151 = vmatmul.mubr.f32.gmra.mrb[6].mxu0 %v2150_v5 }
 0x14d   :  { %4757 = vmatmul.mubr.f32.gmra.mrb[6].mxu1 %v2150_v5  ;;  %2231 = vmatprep.mubr.f32.mxu0 %v6692_v11 }
 0x14e   :  { %4837 = vmatprep.mubr.f32.mxu1 %v6692_v11 }
 0x150   :  { %2233 = vmatmul.mubr.f32.vlgmr.msra.gmra.mrb[0].mxu0 %v6705_v16 }
 0x151   :  { %4839 = vmatmul.mubr.f32.vlgmr.msra.gmra.mrb[0].mxu1 %v6705_v16  ;;  %2238 = vmatprep.mubr.f32.mxu0 %v6715_v12 }
 0x152   :  { %4844 = vmatprep.mubr.f32.mxu1 %v6715_v12  ;;  %2264 = vmatpush1.xpose.msra.mxu0 %v6753_v9 }
 0x153   :  { %4870 = vmatpush1.xpose.msra.mxu1 %v6761_v18  ;;  %2365 = vmatprep.subr.mxu0 %v6662_v24 }
 0x154   :  { %2240 = vmatmul.mubr.f32.gmra.mrb[2].mxu0 %v6734_v51  ;;  %4971 = vmatprep.subr.mxu1 %v6665_v45 }
 0x155   :  { %4846 = vmatmul.mubr.f32.gmra.mrb[2].mxu1 %v6734_v51  ;;  %2245 = vmatprep.mubr.f32.mxu0 %v6744_v15 }
 0x156   :  { %4851 = vmatprep.mubr.f32.mxu1 %v6744_v15 }
 0x158   :  { %2247 = vmatmul.mubr.f32.gmra.mrb[4].mxu0 %v6770_v22 }
 0x159   :  { %4853 = vmatmul.mubr.f32.gmra.mrb[4].mxu1 %v6770_v22  ;;  %2252 = vmatprep.mubr.f32.mxu0 %v6782_v38 }
 0x15a   :  { %4858 = vmatprep.mubr.f32.mxu1 %v6782_v38 }
 0x15c   :  { %2254 = vmatmul.mubr.f32.gmra.mrb[6].mxu0 %v6799_v26 }
 0x15d   :  { %4860 = vmatmul.mubr.f32.gmra.mrb[6].mxu1 %v6799_v26  ;;  %2329 = vmatprep.mubr.f32.mxu0 %v6713_v8 }
 0x15e   :  { %4935 = vmatprep.mubr.f32.mxu1 %v6713_v8 }
 0x160   :  { %2332 = vmatmul.mubr.f32.vlgmr.msra.gmra.mrb[0].mxu0 %v6732_v32 }
 0x161   :  { %4938 = vmatmul.mubr.f32.vlgmr.msra.gmra.mrb[0].mxu1 %v6732_v32  ;;  %2338 = vmatprep.mubr.f32.mxu0 %v6742_v33 }
 0x162   :  { %4944 = vmatprep.mubr.f32.mxu1 %v6742_v33  ;;  %2367 = vmatpush1.xpose.msra.mxu0 %v6722_v13 }
 0x163   :  { %4973 = vmatpush1.xpose.msra.mxu1 %v6728_v17  ;;  %2478 = vmatprep.subr.mxu0 %v2158_v63 }
 0x164   :  { %2341 = vmatmul.mubr.f32.gmra.mrb[2].mxu0 %v6768_v19  ;;  %5084 = vmatprep.subr.mxu1 %v4764_v1 }
 0x165   :  { %4947 = vmatmul.mubr.f32.gmra.mrb[2].mxu1 %v6768_v19  ;;  %2347 = vmatprep.mubr.f32.mxu0 %v6780_v34 }
 0x166   :  { %4953 = vmatprep.mubr.f32.mxu1 %v6780_v34 }
 0x168   :  { %2350 = vmatmul.mubr.f32.gmra.mrb[4].mxu0 %v6797_v25 }
 0x169   :  { %4956 = vmatmul.mubr.f32.gmra.mrb[4].mxu1 %v6797_v25  ;;  %2356 = vmatprep.mubr.f32.mxu0 %v6809_v46 }
 0x16a   :  { %4962 = vmatprep.mubr.f32.mxu1 %v6809_v46 }
 0x16c   :  { %2359 = vmatmul.mubr.f32.gmra.mrb[6].mxu0 %v6825_v57 }
 0x16d   :  { %4965 = vmatmul.mubr.f32.gmra.mrb[6].mxu1 %v6825_v57  ;;  %2433 = vmatprep.mubr.f32.mxu0 %v6739_v53 }
 0x16e   :  { %5039 = vmatprep.mubr.f32.mxu1 %v6739_v53 }
 0x170   :  { %2437 = vmatmul.mubr.f32.vlgmr.msra.gmra.mrb[0].mxu0 %v6765_v10 }
 0x171   :  { %5043 = vmatmul.mubr.f32.vlgmr.msra.gmra.mrb[0].mxu1 %v6765_v10  ;;  %2444 = vmatprep.mubr.f32.mxu0 %v6777_v60 }
 0x172   :  { %5050 = vmatprep.mubr.f32.mxu1 %v6777_v60  ;;  %2482 = vmatpush1.xpose.msra.mxu0 %v2164_v2 }
 0x173   :  { %5088 = vmatpush1.xpose.msra.mxu1 %v4770_v40  ;;  %2575 = vmatprep.subr.mxu0 %v6662_v24 }
 0x174   :  { %2448 = vmatmul.mubr.f32.gmra.mrb[2].mxu0 %v6794_v42  ;;  %5181 = vmatprep.subr.mxu1 %v6665_v45 }
 0x175   :  { %5054 = vmatmul.mubr.f32.gmra.mrb[2].mxu1 %v6794_v42  ;;  %2455 = vmatprep.mubr.f32.mxu0 %v6806_v36 }
 0x176   :  { %5061 = vmatprep.mubr.f32.mxu1 %v6806_v36 }
 0x178   :  { %2459 = vmatmul.mubr.f32.gmra.mrb[4].mxu0 %v6822_v56 }
 0x179   :  { %5065 = vmatmul.mubr.f32.gmra.mrb[4].mxu1 %v6822_v56  ;;  %2466 = vmatprep.mubr.f32.mxu0 %v6831_v62 }
 0x17a   :  { %5072 = vmatprep.mubr.f32.mxu1 %v6831_v62 }
 0x17c   :  { %2470 = vmatmul.mubr.f32.gmra.mrb[6].mxu0 %v6836_v28 }
 0x17d   :  { %5076 = vmatmul.mubr.f32.gmra.mrb[6].mxu1 %v6836_v28  ;;  %2546 = vmatprep.mubr.f32.mxu0 %v6692_v11 }
 0x17e   :  { %5152 = vmatprep.mubr.f32.mxu1 %v6692_v11 }
 0x180   :  { %2548 = vmatmul.mubr.f32.vlgmr.msra.gmra.mrb[0].mxu0 %v6705_v16 }
 0x181   :  { %5154 = vmatmul.mubr.f32.vlgmr.msra.gmra.mrb[0].mxu1 %v6705_v16  ;;  %2553 = vmatprep.mubr.f32.mxu0 %v6715_v12 }
 0x182   :  { %5159 = vmatprep.mubr.f32.mxu1 %v6715_v12  ;;  %2577 = vmatpush1.xpose.msra.mxu0 %v6722_v13 }
 0x183   :  { %5183 = vmatpush1.xpose.msra.mxu1 %v6728_v17 }
 0x184   :  { %2555 = vmatmul.mubr.f32.gmra.mrb[2].mxu0 %v6734_v51 }
 0x185   :  { %5161 = vmatmul.mubr.f32.gmra.mrb[2].mxu1 %v6734_v51  ;;  %2560 = vmatprep.mubr.f32.mxu0 %v6744_v15 }
 0x186   :  { %5166 = vmatprep.mubr.f32.mxu1 %v6744_v15 }
 0x188   :  { %2562 = vmatmul.mubr.f32.gmra.mrb[4].mxu0 %v6770_v22 }
 0x189   :  { %5168 = vmatmul.mubr.f32.gmra.mrb[4].mxu1 %v6770_v22  ;;  %2567 = vmatprep.mubr.f32.mxu0 %v6782_v38 }
 0x18a   :  { %5173 = vmatprep.mubr.f32.mxu1 %v6782_v38 }
 0x18c   :  { %2569 = vmatmul.mubr.f32.gmra.mrb[6].mxu0 %v6799_v26 }
 0x18d   :  { %5175 = vmatmul.mubr.f32.gmra.mrb[6].mxu1 %v6799_v26  ;;  %2641 = vmatprep.mubr.f32.mxu0 %v6692_v11 }
 0x18e   :  { %5247 = vmatprep.mubr.f32.mxu1 %v6692_v11 }
 0x190   :  { %2643 = vmatmul.mubr.f32.vlgmr.msra.gmra.mrb[0].mxu0 %v6705_v16 }
 0x191   :  { %5249 = vmatmul.mubr.f32.vlgmr.msra.gmra.mrb[0].mxu1 %v6705_v16  ;;  %2648 = vmatprep.mubr.f32.mxu0 %v6715_v12 }
 0x192   :  { %5254 = vmatprep.mubr.f32.mxu1 %v6715_v12 }
 0x194   :  { %2650 = vmatmul.mubr.f32.gmra.mrb[2].mxu0 %v6734_v51 }
 0x195   :  { %5256 = vmatmul.mubr.f32.gmra.mrb[2].mxu1 %v6734_v51  ;;  %2655 = vmatprep.mubr.f32.mxu0 %v6744_v15 }
 0x196   :  { %5261 = vmatprep.mubr.f32.mxu1 %v6744_v15 }
 0x198   :  { %2657 = vmatmul.mubr.f32.gmra.mrb[4].mxu0 %v6770_v22 }
 0x199   :  { %5263 = vmatmul.mubr.f32.gmra.mrb[4].mxu1 %v6770_v22  ;;  %2662 = vmatprep.mubr.f32.mxu0 %v6782_v38 }
 0x19a   :  { %5268 = vmatprep.mubr.f32.mxu1 %v6782_v38 }
 0x19c   :  { %2664 = vmatmul.mubr.f32.gmra.mrb[6].mxu0 %v6799_v26 }
 0x19d   :  { %5270 = vmatmul.mubr.f32.gmra.mrb[6].mxu1 %v6799_v26 }
 0x263   :  { %v2644_v24 = vpop.f32.mrb[0].mxu0 }
 0x264   :  { %v5250_v45 = vpop.f32.mrb[0].mxu1  ;;  %v2646_v50 = vpop.f32.mrb[1].mxu0  ;;  %v5275_v1 = vmul.f32 %v2644_v24, %v2644_v24 }
 0x265   :  { %v5324_v58 = vmul.f32 %v5250_v45, %v2644_v24  ;;  %v5252_v63 = vpop.f32.mrb[1].mxu1  ;;  %v5300_v11 = vmul.f32 %v5250_v45, %v5250_v45 }
 0x266   :  { %v5280_v17 = vsel %vm5279_vm0, %v5275_v1, 0.0 }
 0x267   :  { %v2651_v16 = vpop.f32.mrb[2].mxu0  ;;  %v5304_v30 = vsel %vm5279_vm0, %v5300_v11, 0.0  ;;  %v5328_v51 = vsel %vm5279_vm0, %v5324_v58, 0.0 }
 0x268   :  { %v5276_v41 = vmul.f32 %v2651_v16, %v2651_v16  ;;  %v5257_v8 = vpop.f32.mrb[2].mxu1  ;;  %v2653_v12 = vpop.f32.mrb[3].mxu0 }
 0x269   :  { %v5301_v44 = vmul.f32 %v5257_v8, %v5257_v8  ;;  %v5325_v13 = vmul.f32 %v5257_v8, %v2651_v16  ;;  %v5259_v23 = vpop.f32.mrb[3].mxu1 }
 0x26a   :  { %v5281_v32 = vsel %vm5279_vm0, %v5276_v41, 0.0 }
 0x26b   :  { %v5282_v29 = vadd.f32 %v5281_v32, %v5280_v17  ;;  %v5305_v53 = vsel %vm5279_vm0, %v5301_v44, 0.0  ;;  %v5329_v33 = vsel %vm5279_vm0, %v5325_v13, 0.0  ;;  %v2658_v15 = vpop.f32.mrb[4].mxu0 }
 0x26c   :  { %v5306_v20 = vadd.f32 %v5305_v53, %v5304_v30  ;;  %v5330_v9 = vadd.f32 %v5329_v33, %v5328_v51  ;;  %v5277_v55 = vmul.f32 %v2658_v15, %v2658_v15  ;;  %v5264_v18 = vpop.f32.mrb[4].mxu1  ;;  %v2660_v10 = vpop.f32.mrb[5].mxu0 }
 0x26d   :  { %v5302_v19 = vmul.f32 %v5264_v18, %v5264_v18  ;;  %v5326_v22 = vmul.f32 %v5264_v18, %v2658_v15  ;;  %v5266_v52 = vpop.f32.mrb[5].mxu1 }
 0x26e   :  { %v5283_v60 = vsel %vm5279_vm0, %v5277_v55, 0.0 }
 0x26f   :  { %v5284_v34 = vadd.f32 %v5283_v60, %v5282_v29  ;;  %v5307_v38 = vsel %vm5279_vm0, %v5302_v19, 0.0  ;;  %v5331_v39 = vsel %vm5279_vm0, %v5326_v22, 0.0  ;;  %v2665_v2 = vpop.f32.mrb[6].mxu0 }
 0x270   :  { %v5308_v40 = vadd.f32 %v5307_v38, %v5306_v20  ;;  %v5332_v0 = vadd.f32 %v5331_v39, %v5330_v9  ;;  %v5278_v42 = vmul.f32 %v2665_v2, %v2665_v2  ;;  %v5271_v25 = vpop.f32.mrb[6].mxu1  ;;  %v2667_v26 = vpop.f32.mrb[7].mxu0 }
 0x271   :  { %v5303_v6 = vmul.f32 %v5271_v25, %v5271_v25  ;;  %v5327_v35 = vmul.f32 %v5271_v25, %v2665_v2  ;;  %v5273_v36 = vpop.f32.mrb[7].mxu1 }
 0x272   :  { %v5285_v46 = vsel %vm5279_vm0, %v5278_v42, 0.0 }
 0x273   :  { %v5286_v4 = vadd.f32 %v5285_v46, %v5284_v34  ;;  %v5309_v14 = vsel %vm5279_vm0, %v5303_v6, 0.0  ;;  %v5333_v7 = vsel %vm5279_vm0, %v5327_v35, 0.0 }
 0x274   :  { %v5310_v54 = vadd.f32 %v5309_v14, %v5308_v40  ;;  %v5334_v56 = vadd.f32 %v5333_v7, %v5332_v0 }
 0x275   :  { %v5287_v57 = vrot.slane %v5286_v4, 4 }
 0x276   :  { %v5311_v31 = vrot.slane %v5310_v54, 4  ;;  %v5335_v24 = vrot.slane %v5334_v56, 4 }
 0x277   :  { %v5288_v59 = vadd.f32 %v5287_v57, %v5286_v4  ;;  %v5385_v57 = vstv %s5433_s7 }
 0x278   :  { %v5312_v62 = vadd.f32 %v5311_v31, %v5310_v54  ;;  %v5336_v41 = vadd.f32 %v5335_v24, %v5334_v56  ;;  %v5383_v54 = vstv %s5349_s2 }
 0x279   :  { %v5289_v47 = vrot.slane %v5288_v59, 2 }
 0x27a   :  { %v5313_v49 = vrot.slane %v5312_v62, 2  ;;  %v5337_v13 = vrot.slane %v5336_v41, 2 }
 0x27b   :  { %v5290_v48 = vadd.f32 %v5289_v47, %v5288_v59 }
 0x27c   :  { %v5314_v27 = vadd.f32 %v5313_v49, %v5312_v62  ;;  %v5338_v17 = vadd.f32 %v5337_v13, %v5336_v41 }
 0x27d   :  { %v5291_v28 = vrot.slane %v5290_v48, 1 }
 0x27e   :  { %v5315_v21 = vrot.slane %v5314_v27, 1  ;;  %v5339_v30 = vrot.slane %v5338_v17, 1 }
 0x27f   :  { %v5292_v43 = vadd.f32 %v5291_v28, %v5290_v48 }
 0x280   :  { %v5316_v61 = vadd.f32 %v5315_v21, %v5314_v27  ;;  %v5340_v32 = vadd.f32 %v5339_v30, %v5338_v17 }
 0x281   :  { %5811 = vrsqrt.f32 %v5292_v43  ;;  %vm5295_vm1 = vcmp.eq.f32.partialorder %v5292_v43, inf  ;;  %v5298_v45 = vand.u32 2147483648, %v5292_v43  ;;  %vm5297_vm2 = vcmp.eq.f32.partialorder %v5292_v43, 0.0 }
 0x282   :  { %5813 = vrsqrt.f32 %v5316_v61  ;;  %vm5319_vm3 = vcmp.eq.f32.partialorder %v5316_v61, inf  ;;  %v5322_v63 = vand.u32 2147483648, %v5316_v61  ;;  %vm5321_vm4 = vcmp.eq.f32.partialorder %v5316_v61, 0.0 }
 0x28b   :  { %v5812_v3 = vpop.eup %5811 }
 0x28c   :  { %v5814_v37 = vpop.eup %5813  ;;  %v5294_v5 = vmul.f32 %v5812_v3, %v5292_v43 }
 0x28d   :  { %v5318_v50 = vmul.f32 %v5814_v37, %v5316_v61 }
 0x28e   :  { %v5296_v58 = vsel %vm5295_vm1, %v5292_v43, %v5294_v5 }
 0x28f   :  { %v5299_v1 = vsel %vm5297_vm2, %v5298_v45, %v5296_v58  ;;  %v5320_v11 = vsel %vm5319_vm3, %v5316_v61, %v5318_v50 }
 0x290   :  { %v5323_v16 = vsel %vm5321_vm4, %v5322_v63, %v5320_v11  ;;  %v5341_v8 = vmax.f32 %v5299_v1, 1e-12 }
 0x291   :  { %v5342_v12 = vmax.f32 %v5323_v16, 1e-12 }
 0x293   :  { %v5343_v44 = vmul.f32 %v5342_v12, %v5341_v8 }
 0x295   :  { %v5344_v23 = vmax.f32 %v5343_v44, 1e-08 }
 0x297   :  { %5815 = vrcp.f32 %v5344_v23 }
 0x2a1   :  { %v5816_v51 = vpop.eup %5815 }
 0x2a2   :  { %v5346_v29 = vmul.f32 %v5816_v51, %v5340_v32 }
 0x2a4   :  { %v5432_v53 = vclamps-f32 %v5346_v29, 1.0 }
 0x2a6   :  { %v5351_v33 = vand.u32 2147483647, %v5432_v53  ;;  %vm5379_vm8 = vcmp.lt.f32.partialorder %v5432_v53, 0.0 }
 0x2a8   :  { %v5353_v15 = vsub.f32 1.0, %v5351_v33  ;;  %v5355_v9 = vmul.f32 %v5351_v33, %v5351_v33  ;;  %vm5352_vm5 = vcmp.gt.f32.partialorder %v5351_v33, 0.5 }
 0x2aa   :  { %v5354_v20 = vmul.f32 0.5, %v5353_v15 }
 0x2ac   :  { %v5356_v55 = vsel %vm5352_vm5, %v5354_v20, %v5355_v9 }
 0x2ad   :  { %5817 = vrsqrt.f32 %v5356_v55  ;;  %v5365_v18 = vmul.f32 0.0421632, %v5356_v55  ;;  %vm5359_vm6 = vcmp.eq.f32.partialorder %v5356_v55, inf  ;;  %v5362_v39 = vand.u32 2147483648, %v5356_v55 }
 0x2ae   :  { %vm5361_vm7 = vcmp.eq.f32.partialorder %v5356_v55, 0.0 }
 0x2af   :  { %v5366_v10 = vadd.f32 0.024181312, %v5365_v18 }
 0x2b1   :  { %v5367_v19 = vmul.f32 %v5366_v10, %v5356_v55 }
 0x2b3   :  { %v5368_v22 = vadd.f32 0.045470025, %v5367_v19 }
 0x2b5   :  { %v5369_v52 = vmul.f32 %v5368_v22, %v5356_v55 }
 0x2b7   :  { %v5818_v60 = vpop.eup %5817  ;;  %v5370_v38 = vadd.f32 0.074953005, %v5369_v52 }
 0x2b8   :  { %v5358_v34 = vmul.f32 %v5818_v60, %v5356_v55 }
 0x2b9   :  { %v5371_v40 = vmul.f32 %v5370_v38, %v5356_v55 }
 0x2ba   :  { %v5360_v2 = vsel %vm5359_vm6, %v5356_v55, %v5358_v34 }
 0x2bb   :  { %v5363_v0 = vsel %vm5361_vm7, %v5362_v39, %v5360_v2  ;;  %v5372_v25 = vadd.f32 0.16666752, %v5371_v40 }
 0x2bc   :  { %v5364_v42 = vsel %vm5352_vm5, %v5363_v0, %v5351_v33 }
 0x2bd   :  { %v5373_v26 = vmul.f32 %v5364_v42, %v5356_v55 }
 0x2bf   :  { %v5374_v6 = vmul.f32 %v5373_v26, %v5372_v25 }
 0x2c1   :  { %v5375_v35 = vadd.f32 %v5374_v6, %v5364_v42 }
 0x2c3   :  { %v5376_v36 = vmul.f32 2.0, %v5375_v35 }
 0x2c5   :  { %v5377_v46 = vsub.f32 1.5707964, %v5376_v36 }
 0x2c7   :  { %v5378_v4 = vsel %vm5352_vm5, %v5377_v46, %v5375_v35 }
 0x2c8   :  { %v5380_v14 = vsub.f32 0.0, %v5378_v4 }
 0x2ca   :  { %v5381_v7 = vsel %vm5379_vm8, %v5380_v14, %v5378_v4 }
 0x2cb   :  { %v5382_v56 = vsub.f32 1.5707964, %v5381_v7 }
 0x2cd   :  { %v5384_v31 = vmul.f32 %v5383_v54, %v5382_v56 }
 0x2cf   :  { %v5386_v59 = vadd.f32 %v5385_v57, %v5384_v31 }
 0x2d1   :  { %v5387_v62 = vmax.f32 %v5386_v59, 0.0 }
 0x2d3   :  { %v5388_v47 = vmin.f32 %v5387_v62, 3.1415927 }
 0x2d5   :  { %v5389_v49 = vsub.f32 1.5707964, %v5388_v47 }
 0x2d7   :  { %v5390_v48 = vand.u32 2147483647, %v5389_v49  ;;  %v5391_v27 = vmul.f32 %v5389_v49, %v5389_v49  ;;  %vm5411_vm9 = vcmp.ge.f32.partialorder %v5389_v49, 0.0 }
 0x2d9   :  { %v5393_v28 = vmul.f32 -0.00019515296, %v5391_v27  ;;  %v5399_v21 = vsub.f32 1.5707964, %v5390_v48  ;;  %v5392_v1 = vmul.f32 %v5391_v27, %v5389_v49  ;;  %vm5410_vm11 = vcmp.le.f32.partialorder %v5390_v48, 0.7853982 }
 0x2db   :  { %v5394_v43 = vadd.f32 0.008332161, %v5393_v28  ;;  %v5400_v61 = vmul.f32 %v5399_v21, %v5399_v21 }
 0x2dd   :  { %v5404_v3 = vmul.f32 2.4433157e-05, %v5400_v61  ;;  %v5395_v37 = vmul.f32 %v5394_v43, %v5391_v27  ;;  %v5401_v24 = vmul.f32 0.5, %v5400_v61  ;;  %v5403_v58 = vmul.f32 %v5400_v61, %v5400_v61 }
 0x2df   :  { %v5435_v5 = vadd.f32 -0.0013887316, %v5404_v3  ;;  %v5434_v50 = vadd.f32 -0.16666655, %v5395_v37  ;;  %v5402_v11 = vsub.f32 1.0, %v5401_v24 }
 0x2e1   :  { %v5406_v45 = vmul.f32 %v5435_v5, %v5400_v61  ;;  %v5397_v41 = vmul.f32 %v5434_v50, %v5392_v1 }
 0x2e3   :  { %v5407_v63 = vadd.f32 0.041666646, %v5406_v45  ;;  %v5398_v44 = vadd.f32 %v5397_v41, %v5389_v49 }
 0x2e5   :  { %v5408_v16 = vmul.f32 %v5407_v63, %v5403_v58 }
 0x2e7   :  { %v5409_v8 = vadd.f32 %v5408_v16, %v5402_v11 }
 0x2e9   :  { %v5412_v12 = vsub.f32 0.0, %v5409_v8 }
 0x2eb   :  { %v5413_v13 = vsel %vm5411_vm9, %v5409_v8, %v5412_v12 }
 0x2ec   :  { %v5414_v23 = vsel %vm5410_vm11, %v5398_v44, %v5413_v13 }
 0x2ed   :  { %5416 = vst.msk [vmem:[#allocation5] sm:$0x1] %vm5415_vm10, %v5414_v23 }
 0x2ee   :  { %5842 = shalt.err (!%p5839_p9)
}
 0x2ef   :  { %s5843_s14 = scalar_lea.hbm %s6973_s4, 16 }
 0x2f0   :  { %p5844_p10 = scmp.ne.s32.totalorder %s6973_s4, %s5843_s14  ;;  %p5847_p11 = scmp.lt.u32.totalorder %s5843_s14, %s6973_s4 }
 0x2f2   :  { %p5849_p12 = pnand %p5847_p11, %p5844_p10 }
 0x2f4   :  { %5852 = shalt.err (!%p5849_p12)
}
 0x2f5   :  { %5426 = dma.vmem_to_hbm [thread:$0]  %s5424_s9, 16, %s6973_s4, [#allocation3]  }
 0x2f6   :  { %5855 = dma.done.wait [#allocation3], 16  }
 0x2f7   :  { %5856 = vsyncadd [#allocation3], 4294967280 }
 0x2f8   :  { %5430 = vsyncpa [#allocation3], 1 }
 0x2f9   :  { %5431 = vsyncpa [#allocation4], 1 }

</bundles_post_ra>
